<compile_context>
chip_gen: v7x
topology: tpu7x:2x2x1
jax: 0.10.0
libtpu: 0.0.40
codegen_flags: <defaults>
</compile_context>

<pallas_src>
import jax
import jax.numpy as jnp
from jax import lax
from jax.experimental import pallas as pl
from jax.experimental.pallas import tpu as pltpu

KH = KW = 3   # kernel size
PAD = 1       # padding (stride is 1)

_VMEM_STEP_BUDGET = 28 * 1024 * 1024   # target per-grid-step working set


def dwconv_kernel(x_ref, w_ref, b_ref, o_ref, xp_ref):
    # x_ref : (1, H, W, TC)        input tile (I/O dtype)
    # w_ref : (KH*KW, TC)          depthwise taps, channels on lanes
    # b_ref : (1, TC)              conv bias
    # o_ref : (1, H, W, TC)        output tile
    # xp_ref: (1, H+2, W+2, TC)    zero-padded VMEM scratch (compute dtype)
    _, H, W, TC = x_ref.shape
    cdt = xp_ref.dtype

    # In-kernel zero padding: write the 1-pixel halo border, then the interior
    # (cast once to the compute dtype). Full tensor touches HBM exactly once.
    zrow = jnp.zeros((1, PAD, W + 2 * PAD, TC), cdt)
    zcol = jnp.zeros((1, H + 2 * PAD, PAD, TC), cdt)
    xp_ref[:, 0:PAD, :, :] = zrow
    xp_ref[:, H + PAD:H + 2 * PAD, :, :] = zrow
    xp_ref[:, :, 0:PAD, :] = zcol
    xp_ref[:, :, W + PAD:W + 2 * PAD, :] = zcol
    xp_ref[:, PAD:H + PAD, PAD:W + PAD, :] = x_ref[...].astype(cdt)

    w = w_ref[...]          # (9, TC), compute dtype
    b = b_ref[...]          # (1, TC), compute dtype

    # Build the three column-shifted windows ONCE. W is the sublane axis, so
    # the kj=1,2 windows each need one XLU realignment; reusing them across
    # the three ki rows drops realignment work from 6 to 2. The ki slices
    # below are along H, an outer dim -> no cross-lane/sublane movement.
    cols = tuple(xp_ref[:, :, kj:kj + W, :] for kj in range(KW))  # (1,H+2,W,TC)

    # Three independent partial sums (one per kernel row) expose ILP to the
    # 4 VALUs instead of a depth-9 serial accumulation chain.
    parts = []
    for ki in range(KH):
        p = cols[0][:, ki:ki + H] * w[ki * KW + 0]
        p = p + cols[1][:, ki:ki + H] * w[ki * KW + 1]
        p = p + cols[2][:, ki:ki + H] * w[ki * KW + 2]
        parts.append(p)

    acc = (parts[0] + parts[1]) + (parts[2] + b)   # bias broadcasts over H, W
    o_ref[...] = acc.astype(o_ref.dtype)


def _step_vmem_bytes(H, W, tc, io_itemsize, cd_itemsize):
    io = 2 * 2 * H * W * tc * io_itemsize                        # in+out, dbl-buffered
    scratch = (H + 2 * PAD) * (W + 2 * PAD) * tc * cd_itemsize   # padded scratch
    live = 2 * (H + 2 * PAD) * W * tc * cd_itemsize              # shifted-column temps
    return io + scratch + live


def dwconv_lka_nhwc(x_nhwc, w, b, *, compute_dtype=None):
    """Depthwise 3x3 conv (stride 1, pad 1, groups=C) + bias, NHWC end-to-end.

    x_nhwc: (N, H, W, C); w: (C, 1, 3, 3); b: (C,). Returns (N, H, W, C) in
    x_nhwc.dtype. bf16 inputs are computed in bf16 (fastest on v6e/v7x); pass
    compute_dtype=jnp.float32 to force f32 accumulation (e.g. on v5e).
    """
    N, H, W, C = x_nhwc.shape
    if compute_dtype is None:
        compute_dtype = jnp.bfloat16 if x_nhwc.dtype == jnp.bfloat16 else jnp.float32

    # (C, 1, 3, 3) -> (9, C): tap-major, channel-last (one lane vector / tap).
    w9 = jnp.transpose(w.reshape(C, KH * KW), (1, 0)).astype(compute_dtype)
    b2 = b.reshape(1, C).astype(compute_dtype)

    # Keep the output block lane-dense: if C > 128 but not a multiple of 128,
    # pad channels up (zero taps/bias -> zero outputs, sliced away below).
    C_eff = C
    if C > 128 and C % 128 != 0:
        C_eff = ((C + 127) // 128) * 128
        cp = C_eff - C
        x_nhwc = jnp.pad(x_nhwc, ((0, 0), (0, 0), (0, 0), (0, cp)))
        w9 = jnp.pad(w9, ((0, 0), (0, cp)))
        b2 = jnp.pad(b2, ((0, 0), (0, cp)))

    io_b = jnp.dtype(x_nhwc.dtype).itemsize
    cd_b = jnp.dtype(compute_dtype).itemsize

    # Channel tile: largest multiple of 128 that divides C_eff and keeps the
    # per-step working set under budget (fewer grid steps / longer DMA bursts
    # on v5e/v6e; falls back to 128 when spatial size is large, e.g. v7x).
    if C_eff % 128 == 0:
        cands = [t for t in range(min(C_eff, 512), 0, -128) if C_eff % t == 0]
        TC = next((t for t in cands
                   if _step_vmem_bytes(H, W, t, io_b, cd_b) <= _VMEM_STEP_BUDGET), 128)
    else:
        TC = C_eff   # small-channel path: lane dim equals the full array dim

    # TODO(synk): if even TC=128 exceeds the budget (very large H*W on v7x's
    # 64 MiB VMEM), additionally tile H into strips with a 1-row halo.

    vmem_limit = int(min(max(_step_vmem_bytes(H, W, TC, io_b, cd_b) + (8 << 20),
                             32 << 20), 64 << 20))

    grid = (N, C_eff // TC)
    out = pl.pallas_call(
        dwconv_kernel,
        out_shape=jax.ShapeDtypeStruct((N, H, W, C_eff), x_nhwc.dtype),
        grid=grid,
        in_specs=[
            pl.BlockSpec((1, H, W, TC), lambda n, c: (n, 0, 0, c)),
            pl.BlockSpec((KH * KW, TC), lambda n, c: (0, c)),
            pl.BlockSpec((1, TC), lambda n, c: (0, c)),
        ],
        out_specs=pl.BlockSpec((1, H, W, TC), lambda n, c: (n, 0, 0, c)),
        scratch_shapes=[
            pltpu.VMEM((1, H + 2 * PAD, W + 2 * PAD, TC), compute_dtype)],
        compiler_params=pltpu.CompilerParams(
            dimension_semantics=("parallel", "parallel"),
            vmem_limit_bytes=vmem_limit),
    )(x_nhwc, w9, b2)

    if C_eff != C:
        out = out[..., :C]
    return out


def dwconv_lka_forward(x, w, b, *, compute_dtype=None):
    """PyTorch-layout shim: x is (N, C, H, W) like nn.Conv2d.

    Prefer dwconv_lka_nhwc in an NHWC pipeline -- these two transposes are
    pure HBM layout plumbing (each is a full extra read+write of the tensor).
    """
    x_nhwc = jnp.transpose(x, (0, 2, 3, 1))
    out = dwconv_lka_nhwc(x_nhwc, w, b, compute_dtype=compute_dtype)
    return jnp.transpose(out, (0, 3, 1, 2))


def reference_forward(x, w, b):
    """Pure-JAX reference: lax depthwise conv (f32-exact) + bias."""
    C = x.shape[1]
    y = lax.conv_general_dilated(
        x, w, window_strides=(1, 1), padding=((PAD, PAD), (PAD, PAD)),
        dimension_numbers=("NCHW", "OIHW", "NCHW"),
        feature_group_count=C, precision=lax.Precision.HIGHEST)
    return y + b.reshape(1, C, 1, 1)


if __name__ == "__main__":
    key = jax.random.PRNGKey(0)

    def make(N, C, H, W, k):
        kx, kw, kb = jax.random.split(k, 3)
        x = jax.random.normal(kx, (N, C, H, W), jnp.float32)
        w = 0.3 * jax.random.normal(kw, (C, 1, KH, KW), jnp.float32)
        b = 0.1 * jax.random.normal(kb, (C,), jnp.float32)
        return x, w, b

    k1, k2, k3, k4 = jax.random.split(key, 4)

    # 1) Small-channel path (TC = C = 4), NCHW shim, f32 exact.
    x, w, b = make(2, 4, 16, 16, k1)
    out = jax.block_until_ready(dwconv_lka_forward(x, w, b))
    ref = reference_forward(x, w, b)
    assert out.shape == ref.shape
    assert jnp.allclose(out, ref, rtol=1e-5, atol=1e-5), "f32 small-C mismatch"

    # 2) Module-default dim=768: lane-dense, multiple channel tiles (TC=384).
    x, w, b = make(1, 768, 16, 16, k2)
    out = jax.block_until_ready(dwconv_lka_forward(x, w, b))
    ref = reference_forward(x, w, b)
    assert jnp.allclose(out, ref, rtol=1e-5, atol=1e-5), "f32 C=768 mismatch"

    # 3) C > 128 and not a multiple of 128 -> padded-to-256 lane-dense path.
    x, w, b = make(2, 160, 8, 8, k3)
    out = jax.block_until_ready(dwconv_lka_forward(x, w, b))
    ref = reference_forward(x, w, b)
    assert jnp.allclose(out, ref, rtol=1e-5, atol=1e-5), "f32 C=160 pad mismatch"

    # 4) bf16 I/O via the NHWC entry (bf16 VPU math; relaxed tolerance).
    x, w, b = make(2, 256, 16, 16, k4)
    x_bf = x.astype(jnp.bfloat16)
    x_nhwc = jnp.transpose(x_bf, (0, 2, 3, 1))
    out = jax.block_until_ready(dwconv_lka_nhwc(x_nhwc, w, b))
    assert out.dtype == jnp.bfloat16
    out_nchw = jnp.transpose(out, (0, 3, 1, 2)).astype(jnp.float32)
    ref = reference_forward(x_bf.astype(jnp.float32), w, b)
    assert jnp.allclose(out_nchw, ref, rtol=1e-1, atol=1e-1), "bf16 mismatch"

    print("KERNEL_OK")
</pallas_src>

<mosaic_0001>
module attributes {stable_mosaic.version = 11 : i64} {
  func.func @dwconv_kernel(%arg0: i32, %arg1: i32, %arg2: memref<1x16x16x4xf32, #tpu.memory_space<vmem>>, %arg3: memref<9x4xf32, #tpu.memory_space<vmem>>, %arg4: memref<1x4xf32, #tpu.memory_space<vmem>>, %arg5: memref<1x16x16x4xf32, #tpu.memory_space<vmem>>, %arg6: memref<1x18x18x4xf32, #tpu.memory_space<vmem>>) attributes {dimension_semantics = [#tpu.dimension_semantics<parallel>, #tpu.dimension_semantics<parallel>], iteration_bounds = array<i64: 2, 1>, scalar_prefetch = 0 : i64, scratch_operands = 1 : i64, tpu.core_type = #tpu.core_type<tc>, window_params = [{transform_indices = @transform_0, window_bounds = array<i64: 1, 16, 16, 4>}, {transform_indices = @transform_1, window_bounds = array<i64: 9, 4>}, {transform_indices = @transform_2, window_bounds = array<i64: 1, 4>}, {transform_indices = @transform_3, window_bounds = array<i64: 1, 16, 16, 4>}]} {
    %cst = arith.constant 0.000000e+00 : f32
    %0 = vector.broadcast %cst : f32 to vector<1x1x18x4xf32>
    %cst_0 = arith.constant 0.000000e+00 : f32
    %1 = vector.broadcast %cst_0 : f32 to vector<1x18x1x4xf32>
    %c0 = arith.constant 0 : index
    %c0_1 = arith.constant 0 : index
    %c0_2 = arith.constant 0 : index
    %c0_3 = arith.constant 0 : index
    %2 = vector.load %arg6[%c0, %c0_1, %c0_2, %c0_3] : memref<1x18x18x4xf32, #tpu.memory_space<vmem>>, vector<1x1x18x4xf32>
    tpu.vector_store %arg6[%c0, %c0_1, %c0_2, %c0_3], %0 {strides = array<i32>} : memref<1x18x18x4xf32, #tpu.memory_space<vmem>>, vector<1x1x18x4xf32>,
    %c0_4 = arith.constant 0 : index
    %c17 = arith.constant 17 : index
    %c0_5 = arith.constant 0 : index
    %c0_6 = arith.constant 0 : index
    %3 = vector.load %arg6[%c0_4, %c17, %c0_5, %c0_6] : memref<1x18x18x4xf32, #tpu.memory_space<vmem>>, vector<1x1x18x4xf32>
    tpu.vector_store %arg6[%c0_4, %c17, %c0_5, %c0_6], %0 {strides = array<i32>} : memref<1x18x18x4xf32, #tpu.memory_space<vmem>>, vector<1x1x18x4xf32>,
    %c0_7 = arith.constant 0 : index
    %c0_8 = arith.constant 0 : index
    %c0_9 = arith.constant 0 : index
    %c0_10 = arith.constant 0 : index
    %4 = vector.load %arg6[%c0_7, %c0_8, %c0_9, %c0_10] : memref<1x18x18x4xf32, #tpu.memory_space<vmem>>, vector<1x18x1x4xf32>
    tpu.vector_store %arg6[%c0_7, %c0_8, %c0_9, %c0_10], %1 {strides = array<i32>} : memref<1x18x18x4xf32, #tpu.memory_space<vmem>>, vector<1x18x1x4xf32>,
    %c0_11 = arith.constant 0 : index
    %c0_12 = arith.constant 0 : index
    %c17_13 = arith.constant 17 : index
    %c0_14 = arith.constant 0 : index
    %5 = vector.load %arg6[%c0_11, %c0_12, %c17_13, %c0_14] : memref<1x18x18x4xf32, #tpu.memory_space<vmem>>, vector<1x18x1x4xf32>
    tpu.vector_store %arg6[%c0_11, %c0_12, %c17_13, %c0_14], %1 {strides = array<i32>} : memref<1x18x18x4xf32, #tpu.memory_space<vmem>>, vector<1x18x1x4xf32>,
    %c0_15 = arith.constant 0 : index
    %c0_16 = arith.constant 0 : index
    %c0_17 = arith.constant 0 : index
    %c0_18 = arith.constant 0 : index
    %6 = vector.load %arg2[%c0_15, %c0_16, %c0_17, %c0_18] : memref<1x16x16x4xf32, #tpu.memory_space<vmem>>, vector<1x16x16x4xf32>
    %c0_19 = arith.constant 0 : index
    %c1 = arith.constant 1 : index
    %c1_20 = arith.constant 1 : index
    %c0_21 = arith.constant 0 : index
    %7 = vector.load %arg6[%c0_19, %c1, %c1_20, %c0_21] : memref<1x18x18x4xf32, #tpu.memory_space<vmem>>, vector<1x16x16x4xf32>
    tpu.vector_store %arg6[%c0_19, %c1, %c1_20, %c0_21], %6 {strides = array<i32>} : memref<1x18x18x4xf32, #tpu.memory_space<vmem>>, vector<1x16x16x4xf32>,
    %c0_22 = arith.constant 0 : index
    %c0_23 = arith.constant 0 : index
    %8 = vector.load %arg3[%c0_22, %c0_23] : memref<9x4xf32, #tpu.memory_space<vmem>>, vector<9x4xf32>
    %c0_24 = arith.constant 0 : index
    %c0_25 = arith.constant 0 : index
    %9 = vector.load %arg4[%c0_24, %c0_25] : memref<1x4xf32, #tpu.memory_space<vmem>>, vector<1x4xf32>
    %c0_26 = arith.constant 0 : index
    %c0_27 = arith.constant 0 : index
    %c0_28 = arith.constant 0 : index
    %c0_29 = arith.constant 0 : index
    %10 = vector.load %arg6[%c0_26, %c0_27, %c0_28, %c0_29] : memref<1x18x18x4xf32, #tpu.memory_space<vmem>>, vector<1x18x16x4xf32>
    %c0_30 = arith.constant 0 : index
    %c0_31 = arith.constant 0 : index
    %c1_32 = arith.constant 1 : index
    %c0_33 = arith.constant 0 : index
    %11 = vector.load %arg6[%c0_30, %c0_31, %c1_32, %c0_33] : memref<1x18x18x4xf32, #tpu.memory_space<vmem>>, vector<1x18x16x4xf32>
    %c0_34 = arith.constant 0 : index
    %c0_35 = arith.constant 0 : index
    %c2 = arith.constant 2 : index
    %c0_36 = arith.constant 0 : index
    %12 = vector.load %arg6[%c0_34, %c0_35, %c2, %c0_36] : memref<1x18x18x4xf32, #tpu.memory_space<vmem>>, vector<1x18x16x4xf32>
    %13 = vector.extract_strided_slice %10 {offsets = [0, 0, 0, 0], sizes = [1, 16, 16, 4], strides = [1, 1, 1, 1]} : vector<1x18x16x4xf32> to vector<1x16x16x4xf32>
    %14 = vector.extract_strided_slice %8 {offsets = [0, 0], sizes = [1, 4], strides = [1, 1]} : vector<9x4xf32> to vector<1x4xf32>
    %15 = vector.shape_cast %14 : vector<1x4xf32> to vector<4xf32>
    %16 = vector.shape_cast %15 : vector<4xf32> to vector<1x1x1x4xf32>
    %17 = vector.broadcast %16 : vector<1x1x1x4xf32> to vector<1x16x16x4xf32>
    %18 = arith.mulf %13, %17 : vector<1x16x16x4xf32>
    %19 = vector.extract_strided_slice %11 {offsets = [0, 0, 0, 0], sizes = [1, 16, 16, 4], strides = [1, 1, 1, 1]} : vector<1x18x16x4xf32> to vector<1x16x16x4xf32>
    %20 = vector.extract_strided_slice %8 {offsets = [1, 0], sizes = [1, 4], strides = [1, 1]} : vector<9x4xf32> to vector<1x4xf32>
    %21 = vector.shape_cast %20 : vector<1x4xf32> to vector<4xf32>
    %22 = vector.shape_cast %21 : vector<4xf32> to vector<1x1x1x4xf32>
    %23 = vector.broadcast %22 : vector<1x1x1x4xf32> to vector<1x16x16x4xf32>
    %24 = arith.mulf %19, %23 : vector<1x16x16x4xf32>
    %25 = arith.addf %18, %24 : vector<1x16x16x4xf32>
    %26 = vector.extract_strided_slice %12 {offsets = [0, 0, 0, 0], sizes = [1, 16, 16, 4], strides = [1, 1, 1, 1]} : vector<1x18x16x4xf32> to vector<1x16x16x4xf32>
    %27 = vector.extract_strided_slice %8 {offsets = [2, 0], sizes = [1, 4], strides = [1, 1]} : vector<9x4xf32> to vector<1x4xf32>
    %28 = vector.shape_cast %27 : vector<1x4xf32> to vector<4xf32>
    %29 = vector.shape_cast %28 : vector<4xf32> to vector<1x1x1x4xf32>
    %30 = vector.broadcast %29 : vector<1x1x1x4xf32> to vector<1x16x16x4xf32>
    %31 = arith.mulf %26, %30 : vector<1x16x16x4xf32>
    %32 = arith.addf %25, %31 : vector<1x16x16x4xf32>
    %33 = vector.extract_strided_slice %10 {offsets = [0, 1, 0, 0], sizes = [1, 16, 16, 4], strides = [1, 1, 1, 1]} : vector<1x18x16x4xf32> to vector<1x16x16x4xf32>
    %34 = vector.extract_strided_slice %8 {offsets = [3, 0], sizes = [1, 4], strides = [1, 1]} : vector<9x4xf32> to vector<1x4xf32>
    %35 = vector.shape_cast %34 : vector<1x4xf32> to vector<4xf32>
    %36 = vector.shape_cast %35 : vector<4xf32> to vector<1x1x1x4xf32>
    %37 = vector.broadcast %36 : vector<1x1x1x4xf32> to vector<1x16x16x4xf32>
    %38 = arith.mulf %33, %37 : vector<1x16x16x4xf32>
    %39 = vector.extract_strided_slice %11 {offsets = [0, 1, 0, 0], sizes = [1, 16, 16, 4], strides = [1, 1, 1, 1]} : vector<1x18x16x4xf32> to vector<1x16x16x4xf32>
    %40 = vector.extract_strided_slice %8 {offsets = [4, 0], sizes = [1, 4], strides = [1, 1]} : vector<9x4xf32> to vector<1x4xf32>
    %41 = vector.shape_cast %40 : vector<1x4xf32> to vector<4xf32>
    %42 = vector.shape_cast %41 : vector<4xf32> to vector<1x1x1x4xf32>
    %43 = vector.broadcast %42 : vector<1x1x1x4xf32> to vector<1x16x16x4xf32>
    %44 = arith.mulf %39, %43 : vector<1x16x16x4xf32>
    %45 = arith.addf %38, %44 : vector<1x16x16x4xf32>
    %46 = vector.extract_strided_slice %12 {offsets = [0, 1, 0, 0], sizes = [1, 16, 16, 4], strides = [1, 1, 1, 1]} : vector<1x18x16x4xf32> to vector<1x16x16x4xf32>
    %47 = vector.extract_strided_slice %8 {offsets = [5, 0], sizes = [1, 4], strides = [1, 1]} : vector<9x4xf32> to vector<1x4xf32>
    %48 = vector.shape_cast %47 : vector<1x4xf32> to vector<4xf32>
    %49 = vector.shape_cast %48 : vector<4xf32> to vector<1x1x1x4xf32>
    %50 = vector.broadcast %49 : vector<1x1x1x4xf32> to vector<1x16x16x4xf32>
    %51 = arith.mulf %46, %50 : vector<1x16x16x4xf32>
    %52 = arith.addf %45, %51 : vector<1x16x16x4xf32>
    %53 = vector.extract_strided_slice %10 {offsets = [0, 2, 0, 0], sizes = [1, 16, 16, 4], strides = [1, 1, 1, 1]} : vector<1x18x16x4xf32> to vector<1x16x16x4xf32>
    %54 = vector.extract_strided_slice %8 {offsets = [6, 0], sizes = [1, 4], strides = [1, 1]} : vector<9x4xf32> to vector<1x4xf32>
    %55 = vector.shape_cast %54 : vector<1x4xf32> to vector<4xf32>
    %56 = vector.shape_cast %55 : vector<4xf32> to vector<1x1x1x4xf32>
    %57 = vector.broadcast %56 : vector<1x1x1x4xf32> to vector<1x16x16x4xf32>
    %58 = arith.mulf %53, %57 : vector<1x16x16x4xf32>
    %59 = vector.extract_strided_slice %11 {offsets = [0, 2, 0, 0], sizes = [1, 16, 16, 4], strides = [1, 1, 1, 1]} : vector<1x18x16x4xf32> to vector<1x16x16x4xf32>
    %60 = vector.extract_strided_slice %8 {offsets = [7, 0], sizes = [1, 4], strides = [1, 1]} : vector<9x4xf32> to vector<1x4xf32>
    %61 = vector.shape_cast %60 : vector<1x4xf32> to vector<4xf32>
    %62 = vector.shape_cast %61 : vector<4xf32> to vector<1x1x1x4xf32>
    %63 = vector.broadcast %62 : vector<1x1x1x4xf32> to vector<1x16x16x4xf32>
    %64 = arith.mulf %59, %63 : vector<1x16x16x4xf32>
    %65 = arith.addf %58, %64 : vector<1x16x16x4xf32>
    %66 = vector.extract_strided_slice %12 {offsets = [0, 2, 0, 0], sizes = [1, 16, 16, 4], strides = [1, 1, 1, 1]} : vector<1x18x16x4xf32> to vector<1x16x16x4xf32>
    %67 = vector.extract_strided_slice %8 {offsets = [8, 0], sizes = [1, 4], strides = [1, 1]} : vector<9x4xf32> to vector<1x4xf32>
    %68 = vector.shape_cast %67 : vector<1x4xf32> to vector<4xf32>
    %69 = vector.shape_cast %68 : vector<4xf32> to vector<1x1x1x4xf32>
    %70 = vector.broadcast %69 : vector<1x1x1x4xf32> to vector<1x16x16x4xf32>
    %71 = arith.mulf %66, %70 : vector<1x16x16x4xf32>
    %72 = arith.addf %65, %71 : vector<1x16x16x4xf32>
    %73 = arith.addf %32, %52 : vector<1x16x16x4xf32>
    %74 = vector.shape_cast %9 : vector<1x4xf32> to vector<1x1x1x4xf32>
    %75 = vector.broadcast %74 : vector<1x1x1x4xf32> to vector<1x16x16x4xf32>
    %76 = arith.addf %72, %75 : vector<1x16x16x4xf32>
    %77 = arith.addf %73, %76 : vector<1x16x16x4xf32>
    %c0_37 = arith.constant 0 : index
    %c0_38 = arith.constant 0 : index
    %c0_39 = arith.constant 0 : index
    %c0_40 = arith.constant 0 : index
    %78 = vector.load %arg5[%c0_37, %c0_38, %c0_39, %c0_40] : memref<1x16x16x4xf32, #tpu.memory_space<vmem>>, vector<1x16x16x4xf32>
    tpu.vector_store %arg5[%c0_37, %c0_38, %c0_39, %c0_40], %77 {strides = array<i32>} : memref<1x16x16x4xf32, #tpu.memory_space<vmem>>, vector<1x16x16x4xf32>,
    return
  }
  func.func @transform_0(%arg0: i32, %arg1: i32) -> (i32, i32, i32, i32) {
    %c0_i32 = arith.constant 0 : i32
    %c0_i32_0 = arith.constant 0 : i32
    %c0_i32_1 = arith.constant 0 : i32
    return %arg0, %c0_i32, %c0_i32_0, %arg1 : i32, i32, i32, i32
  }
  func.func @transform_1(%arg0: i32, %arg1: i32) -> (i32, i32) {
    %c0_i32 = arith.constant 0 : i32
    %c0_i32_0 = arith.constant 0 : i32
    return %c0_i32, %arg1 : i32, i32
  }
  func.func @transform_2(%arg0: i32, %arg1: i32) -> (i32, i32) {
    %c0_i32 = arith.constant 0 : i32
    %c0_i32_0 = arith.constant 0 : i32
    return %c0_i32, %arg1 : i32, i32
  }
  func.func @transform_3(%arg0: i32, %arg1: i32) -> (i32, i32, i32, i32) {
    %c0_i32 = arith.constant 0 : i32
    %c0_i32_0 = arith.constant 0 : i32
    %c0_i32_1 = arith.constant 0 : i32
    return %arg0, %c0_i32, %c0_i32_0, %arg1 : i32, i32, i32, i32
  }
}

</mosaic_0001>

<bundles_post_ra>
// kernel: tpu_custom_call.1
= control target key start
LH: loop header
LB: loop body
LE: loop exit
PB: predicated region body
PF: predicated region fallthrough
CT: control target
= control target key end

     0   :  { %s1305_s12 = smov 0   ;;  %s1307_s13 = smov 0   ;;  %s2324_s0 = inlined_call_operand.vmem [shape: f32[2,16,16,4], index: 0, kind: input, shape index: {}]   ;;  %s2325_s1 = inlined_call_operand.vmem [shape: f32[9,4], index: 1, kind: input, shape index: {}]   ;;  %s2326_s2 = inlined_call_operand.vmem [shape: f32[1,4], index: 2, kind: input, shape index: {}]   ;;  %s2327_s3 = inlined_call_operand.vmem [shape: f32[2,16,16,4], index: 3, kind: output, shape index: {}]  }
   0x1   :  { %s1309_s14 = smov 0  }
   0x2 LB: > { %s25_s15 = sadd.s32 1, %s1278_s13  ;;  %p1222_p0 = scmp.ge.s32.totalorder %s1282_s14, 1  ;;  %s1282_s14 = sphi %s1309_s14, %s13_s14   ;;  %s1278_s13 = sphi %s1307_s13, %s2329_s13   ;;  %s1274_s12 = sphi %s1305_s12, %s2328_s12  }
   0x3   : > { %p27_p1 = scmp.ge.s32.totalorder %s25_s15, 2  ;;  %p173_p2 = scmp.lt.s32.totalorder %s1282_s14, 3 }
   0x5   : > { %s2331_s15 = smov (%p27_p1, %s25_s15), 0  ;;  %p174_p3 = pnand %p1222_p0, %p173_p2 }
   0x6   : > { %vm233_vm0 = vcmask (!%p174_p3), 31744   ;;  %vm242_vm1 = vcmask (!%p174_p3), 24576   ;;  %vm236_vm2 = vcmask (!%p174_p3), 25600   ;;  %p210_p4 = scmp.lt.s32.totalorder (!%p174_p3), %s1274_s12, 1  ;;  %v1284_v0 = vmov (!%p174_p3), 0.0   ;;  %v1401_v12 = vld [vmem:[%s2325_s1] sm:$0xff] (!%p174_p3) }
   0x7   : > { %177 = sbr.rel (%p174_p3) target bundleno = 188 (0xbc), region = 32  ;;  %234 = vst.msk [vmem:[#allocation2] sm:$0xff] (!%p174_p3), %vm233_vm0, %v1284_v0  ;;  %235 = vst.msk [vmem:[#allocation2 + $0x8] sm:$0xff] (!%p174_p3), %vm233_vm0, %v1284_v0  ;;  %v455_v1 = vlaneseq (!%p174_p3)  ;;  %v1465_v45 = vld [vmem:[%s2325_s1 + $0x8] ss:$0 sm:$0xff] (!%p174_p3) }
   0x8   : > { %239 = vst.msk [vmem:[#allocation2 + $0x198] sm:$0xff] (!%p174_p3), %vm233_vm0, %v1284_v0  ;;  %240 = vst.msk [vmem:[#allocation2 + $0x1a0] sm:$0xff] (!%p174_p3), %vm233_vm0, %v1284_v0 }
   0x9   : > { %244 = vst.msk [vmem:[#allocation2 + $0x18] sm:$0x1] (!%p174_p3), %vm242_vm1, %v1284_v0  ;;  %245 = vst.msk [vmem:[#allocation2 + $0x30] sm:$0x1] (!%p174_p3), %vm242_vm1, %v1284_v0  ;;  %v1381_v2 = vshrl.u32 (!%p174_p3), %v455_v1, 7 }
   0xa   : > { %246 = vst.msk [vmem:[#allocation2 + $0x48] sm:$0x1] (!%p174_p3), %vm242_vm1, %v1284_v0  ;;  %247 = vst.msk [vmem:[#allocation2 + $0x60] sm:$0x1] (!%p174_p3), %vm242_vm1, %v1284_v0 }
   0xb   : > { %248 = vst.msk [vmem:[#allocation2 + $0x78] sm:$0x1] (!%p174_p3), %vm242_vm1, %v1284_v0  ;;  %249 = vst.msk [vmem:[#allocation2 + $0x90] sm:$0x1] (!%p174_p3), %vm242_vm1, %v1284_v0  ;;  %v457_v16 = vsub.s32 (!%p174_p3), 0, %v1381_v2  ;;  %v493_v20 = vsub.s32 (!%p174_p3), 1, %v1381_v2 }
   0xc   : > { %250 = vst.msk [vmem:[#allocation2 + $0xa8] sm:$0x1] (!%p174_p3), %vm242_vm1, %v1284_v0  ;;  %251 = vst.msk [vmem:[#allocation2 + $0xc0] sm:$0x1] (!%p174_p3), %vm242_vm1, %v1284_v0  ;;  %v629_v21 = vsub.s32 (!%p174_p3), 3, %v1381_v2  ;;  %v561_v25 = vsub.s32 (!%p174_p3), 2, %v1381_v2 }
   0xd   : > { %252 = vst.msk [vmem:[#allocation2 + $0xd8] sm:$0x1] (!%p174_p3), %vm242_vm1, %v1284_v0  ;;  %253 = vst.msk [vmem:[#allocation2 + $0xf0] sm:$0x1] (!%p174_p3), %vm242_vm1, %v1284_v0  ;;  %v665_v26 = vsub.s32 (!%p174_p3), 4, %v1381_v2  ;;  %v733_v30 = vsub.s32 (!%p174_p3), 5, %v1381_v2  ;;  %v1441_v35 = vrot.slane (!%p174_p3), %v1401_v12, %v457_v16  ;;  %v1451_v40 = vrot.slane (!%p174_p3), %v1401_v12, %v493_v20 }
   0xe   : > { %254 = vst.msk [vmem:[#allocation2 + $0x108] sm:$0x1] %vm242_vm1, %v1284_v0  ;;  %255 = vst.msk [vmem:[#allocation2 + $0x120] sm:$0x1] %vm242_vm1, %v1284_v0  ;;  %s2333_s12 = smov (!%p210_p4, %s1274_s12), 1  ;;  %v801_v31 = vsub.s32 6, %v1381_v2  ;;  %v1454_v41 = vrot.slane %v1401_v12, %v629_v21  ;;  %v1468_v46 = vrot.slane %v1401_v12, %v561_v25 }
   0xf   : > { %256 = vst.msk [vmem:[#allocation2 + $0x138] sm:$0x1] %vm242_vm1, %v1284_v0  ;;  %257 = vst.msk [vmem:[#allocation2 + $0x150] sm:$0x1] %vm242_vm1, %v1284_v0  ;;  %s1231_s16 = sshll.u32 %s2333_s12, 8  ;;  %v837_v36 = vsub.s32 7, %v1381_v2  ;;  %v1471_v47 = vrot.slane %v1401_v12, %v665_v26  ;;  %v1479_v51 = vrot.slane %v1401_v12, %v733_v30 }
  0x10   : > { %258 = vst.msk [vmem:[#allocation2 + $0x168] sm:$0x1] %vm242_vm1, %v1284_v0  ;;  %259 = vst.msk [vmem:[#allocation2 + $0x180] sm:$0x1] %vm242_vm1, %v1284_v0  ;;  %s1379_s19 = scalar_lea.vmem %s2324_s0, %s1231_s16  ;;  %v1482_v52 = vrot.slane %v1401_v12, %v801_v31  ;;  %v383_v55 = vld [vmem:[#allocation2 + $0x1] sm:$0xff]  ;;  %s1543_s28 = scalar_lea.vmem %s2327_s3, %s1231_s16 }
  0x11   : > { %262 = vst.msk [vmem:[#allocation2 + $0x29] sm:$0x1] %vm242_vm1, %v1284_v0  ;;  %263 = vst.msk [vmem:[#allocation2 + $0x41] sm:$0x1] %vm242_vm1, %v1284_v0  ;;  %v279_v3 = vld [vmem:[%s1379_s19] sm:$0xff]  ;;  %v280_v4 = vld [vmem:[%s1379_s19 + $0x8] sm:$0xff]  ;;  %v1490_v57 = vrot.slane %v1401_v12, %v837_v36  ;;  %v495_v61 = vmul.f32 %v1451_v40, %v383_v55 }
  0x12   : > { %264 = vst.msk [vmem:[#allocation2 + $0x59] sm:$0x1] %vm242_vm1, %v1284_v0  ;;  %265 = vst.msk [vmem:[#allocation2 + $0x71] sm:$0x1] %vm242_vm1, %v1284_v0  ;;  %v281_v5 = vld [vmem:[%s1379_s19 + $0x10] sm:$0xff]  ;;  %v282_v6 = vld [vmem:[%s1379_s19 + $0x18] sm:$0xff] }
  0x13   : > { %266 = vst.msk [vmem:[#allocation2 + $0x89] sm:$0x1] %vm242_vm1, %v1284_v0  ;;  %267 = vst.msk [vmem:[#allocation2 + $0xa1] sm:$0x1] %vm242_vm1, %v1284_v0  ;;  %v283_v7 = vld [vmem:[%s1379_s19 + $0x20] sm:$0xff]  ;;  %v284_v8 = vld [vmem:[%s1379_s19 + $0x28] sm:$0xff] }
  0x14   : > { %268 = vst.msk [vmem:[#allocation2 + $0xb9] sm:$0x1] %vm242_vm1, %v1284_v0  ;;  %269 = vst.msk [vmem:[#allocation2 + $0xd1] sm:$0x1] %vm242_vm1, %v1284_v0  ;;  %v285_v9 = vld [vmem:[%s1379_s19 + $0x30] sm:$0xff]  ;;  %v286_v10 = vld [vmem:[%s1379_s19 + $0x38] sm:$0xff] }
  0x15   : > { %270 = vst.msk [vmem:[#allocation2 + $0xe9] sm:$0x1] %vm242_vm1, %v1284_v0  ;;  %271 = vst.msk [vmem:[#allocation2 + $0x101] sm:$0x1] %vm242_vm1, %v1284_v0  ;;  %v287_v11 = vld [vmem:[%s1379_s19 + $0x40] sm:$0xff]  ;;  %v288_v13 = vld [vmem:[%s1379_s19 + $0x48] sm:$0xff] }
  0x16   : > { %272 = vst.msk [vmem:[#allocation2 + $0x119] sm:$0x1] %vm242_vm1, %v1284_v0  ;;  %273 = vst.msk [vmem:[#allocation2 + $0x131] sm:$0x1] %vm242_vm1, %v1284_v0  ;;  %v289_v14 = vld [vmem:[%s1379_s19 + $0x50] sm:$0xff]  ;;  %v290_v15 = vld [vmem:[%s1379_s19 + $0x58] sm:$0xff] }
  0x17   : > { %274 = vst.msk [vmem:[#allocation2 + $0x149] sm:$0x1] %vm242_vm1, %v1284_v0  ;;  %275 = vst.msk [vmem:[#allocation2 + $0x161] sm:$0x1] %vm242_vm1, %v1284_v0  ;;  %v291_v17 = vld [vmem:[%s1379_s19 + $0x60] sm:$0xff]  ;;  %v292_v18 = vld [vmem:[%s1379_s19 + $0x68] sm:$0xff] }
  0x18   : > { %276 = vst.msk [vmem:[#allocation2 + $0x179] sm:$0x1] %vm242_vm1, %v1284_v0  ;;  %277 = vst.msk [vmem:[#allocation2 + $0x191] sm:$0x1] %vm242_vm1, %v1284_v0  ;;  %v293_v19 = vld [vmem:[%s1379_s19 + $0x70] sm:$0xff]  ;;  %v294_v22 = vld [vmem:[%s1379_s19 + $0x78] sm:$0xff] }
  0x19   : > { %237 = vst.msk [vmem:[#allocation2 + $0x10] sm:$0x3] %vm236_vm2, %v1284_v0  ;;  %241 = vst.msk [vmem:[#allocation2 + $0x1a8] sm:$0x3] %vm236_vm2, %v1284_v0  ;;  %v295_v23 = vld [vmem:[%s1379_s19 + $0x80] sm:$0xff]  ;;  %v296_v24 = vld [vmem:[%s1379_s19 + $0x88] sm:$0xff] }
  0x1a   : > { %243 = vst.msk [vmem:[#allocation2] sm:$0x1] %vm242_vm1, %v1284_v0  ;;  %260 = vst.msk [vmem:[#allocation2 + $0x198] sm:$0x1] %vm242_vm1, %v1284_v0  ;;  %v297_v27 = vld [vmem:[%s1379_s19 + $0x90] sm:$0xff]  ;;  %v298_v28 = vld [vmem:[%s1379_s19 + $0x98] sm:$0xff] }
  0x1b   : > { %261 = vst.msk [vmem:[#allocation2 + $0x11] sm:$0x1] %vm242_vm1, %v1284_v0  ;;  %278 = vst.msk [vmem:[#allocation2 + $0x1a9] sm:$0x1] %vm242_vm1, %v1284_v0  ;;  %v299_v29 = vld [vmem:[%s1379_s19 + $0xa0] sm:$0xff]  ;;  %v300_v32 = vld [vmem:[%s1379_s19 + $0xa8] sm:$0xff] }
  0x1c   : > { %312 = vst.msk [vmem:[#allocation2 + $0x19] sm:$0xff] %vm233_vm0, %v279_v3  ;;  %313 = vst.msk [vmem:[#allocation2 + $0x21] sm:$0xff] %vm233_vm0, %v280_v4  ;;  %v301_v33 = vld [vmem:[%s1379_s19 + $0xb0] sm:$0xff]  ;;  %v302_v34 = vld [vmem:[%s1379_s19 + $0xb8] sm:$0xff] }
  0x1d   : > { %314 = vst.msk [vmem:[#allocation2 + $0x31] sm:$0xff] %vm233_vm0, %v281_v5  ;;  %315 = vst.msk [vmem:[#allocation2 + $0x39] sm:$0xff] %vm233_vm0, %v282_v6  ;;  %v303_v37 = vld [vmem:[%s1379_s19 + $0xc0] sm:$0xff]  ;;  %v304_v38 = vld [vmem:[%s1379_s19 + $0xc8] sm:$0xff] }
  0x1e   : > { %316 = vst.msk [vmem:[#allocation2 + $0x49] sm:$0xff] %vm233_vm0, %v283_v7  ;;  %317 = vst.msk [vmem:[#allocation2 + $0x51] sm:$0xff] %vm233_vm0, %v284_v8  ;;  %v305_v39 = vld [vmem:[%s1379_s19 + $0xd0] sm:$0xff]  ;;  %v306_v42 = vld [vmem:[%s1379_s19 + $0xd8] sm:$0xff] }
  0x1f   : > { %318 = vst.msk [vmem:[#allocation2 + $0x61] sm:$0xff] %vm233_vm0, %v285_v9  ;;  %319 = vst.msk [vmem:[#allocation2 + $0x69] sm:$0xff] %vm233_vm0, %v286_v10  ;;  %v307_v43 = vld [vmem:[%s1379_s19 + $0xe0] sm:$0xff]  ;;  %v308_v44 = vld [vmem:[%s1379_s19 + $0xe8] sm:$0xff] }
  0x20   : > { %320 = vst.msk [vmem:[#allocation2 + $0x79] sm:$0xff] %vm233_vm0, %v287_v11  ;;  %321 = vst.msk [vmem:[#allocation2 + $0x81] sm:$0xff] %vm233_vm0, %v288_v13  ;;  %v309_v48 = vld [vmem:[%s1379_s19 + $0xf0] sm:$0xff]  ;;  %v310_v49 = vld [vmem:[%s1379_s19 + $0xf8] sm:$0xff] }
  0x21   : > { %322 = vst.msk [vmem:[#allocation2 + $0x91] sm:$0xff] %vm233_vm0, %v289_v14  ;;  %323 = vst.msk [vmem:[#allocation2 + $0x99] sm:$0xff] %vm233_vm0, %v290_v15  ;;  %v347_v50 = vld [vmem:[#allocation2] sm:$0xff]  ;;  %v348_v6 = vld [vmem:[#allocation2 + $0x8] sm:$0xff] }
  0x22   : > { %324 = vst.msk [vmem:[#allocation2 + $0xa9] sm:$0xff] %vm233_vm0, %v291_v17  ;;  %325 = vst.msk [vmem:[#allocation2 + $0xb1] sm:$0xff] %vm233_vm0, %v292_v18  ;;  %v459_v56 = vmul.f32 %v1441_v35, %v347_v50  ;;  %v419_v60 = vld [vmem:[#allocation2 + $0x2] sm:$0xff]  ;;  %v460_v14 = vmul.f32 %v1441_v35, %v348_v6 }
  0x23   : > { %326 = vst.msk [vmem:[#allocation2 + $0xc1] sm:$0xff] %vm233_vm0, %v293_v19  ;;  %327 = vst.msk [vmem:[#allocation2 + $0xc9] sm:$0xff] %vm233_vm0, %v294_v22  ;;  %v349_v53 = vld [vmem:[#allocation2 + $0x18] sm:$0xff]  ;;  %v563_v3 = vmul.f32 %v1468_v46, %v419_v60  ;;  %v350_v11 = vld [vmem:[#allocation2 + $0x20] sm:$0xff] }
  0x24   : > { %328 = vst.msk [vmem:[#allocation2 + $0xd9] sm:$0xff] %vm233_vm0, %v295_v23  ;;  %329 = vst.msk [vmem:[#allocation2 + $0xe1] sm:$0xff] %vm233_vm0, %v296_v24  ;;  %v1486_v54 = vld [vmem:[#allocation2 + $0x30] sm:$0xff]  ;;  %v385_v58 = vld [vmem:[#allocation2 + $0x19] sm:$0xff]  ;;  %v631_v62 = vmul.f32 %v1454_v41, %v349_v53  ;;  %v461_v0 = vmul.f32 %v1441_v35, %v349_v53  ;;  %v527_v8 = vadd.f32 %v495_v61, %v459_v56 }
  0x25   : > { %330 = vst.msk [vmem:[#allocation2 + $0xf1] sm:$0xff] %vm233_vm0, %v297_v27  ;;  %331 = vst.msk [vmem:[#allocation2 + $0xf9] sm:$0xff] %vm233_vm0, %v298_v28  ;;  %v1492_v59 = vld [vmem:[#allocation2 + $0x31] sm:$0xff]  ;;  %v803_v63 = vmul.f32 %v1482_v52, %v1486_v54  ;;  %v421_v1 = vld [vmem:[#allocation2 + $0x1a] sm:$0xff]  ;;  %v667_v4 = vmul.f32 %v1471_v47, %v385_v58  ;;  %v497_v7 = vmul.f32 %v1451_v40, %v385_v58 }
  0x26   : > { %332 = vst.msk [vmem:[#allocation2 + $0x109] sm:$0xff] %vm233_vm0, %v299_v29  ;;  %333 = vst.msk [vmem:[#allocation2 + $0x111] sm:$0xff] %vm233_vm0, %v300_v32  ;;  %v1499_v2 = vld [vmem:[#allocation2 + $0x32] sm:$0xff]  ;;  %v839_v5 = vmul.f32 %v1490_v57, %v1492_v59  ;;  %v735_v9 = vmul.f32 %v1479_v51, %v421_v1  ;;  %v384_v13 = vld [vmem:[#allocation2 + $0x9] sm:$0xff]  ;;  %v632_v21 = vmul.f32 %v1454_v41, %v350_v11 }
  0x27   : > { %334 = vst.msk [vmem:[#allocation2 + $0x121] sm:$0xff] %vm233_vm0, %v301_v33  ;;  %335 = vst.msk [vmem:[#allocation2 + $0x129] sm:$0xff] %vm233_vm0, %v302_v34  ;;  %v907_v10 = vmul.f32 %v1465_v45, %v1499_v2  ;;  %v1509_v12 = vld [vmem:[#allocation2 + $0x38] sm:$0xff]  ;;  %v699_v15 = vadd.f32 %v667_v4, %v631_v62  ;;  %v386_v17 = vld [vmem:[#allocation2 + $0x21] sm:$0xff]  ;;  %v496_v20 = vmul.f32 %v1451_v40, %v384_v13 }
  0x28   : > { %336 = vst.msk [vmem:[#allocation2 + $0x139] sm:$0xff] %vm233_vm0, %v303_v37  ;;  %337 = vst.msk [vmem:[#allocation2 + $0x141] sm:$0xff] %vm233_vm0, %v304_v38  ;;  %v871_v16 = vadd.f32 %v839_v5, %v803_v63  ;;  %v1512_v18 = vld [vmem:[#allocation2 + $0x39] sm:$0xff]  ;;  %v420_v19 = vld [vmem:[#allocation2 + $0xa] sm:$0xff]  ;;  %v595_v22 = vadd.f32 %v563_v3, %v527_v8  ;;  %v668_v26 = vmul.f32 %v1471_v47, %v386_v17 }
  0x29   : > { %338 = vst.msk [vmem:[#allocation2 + $0x151] sm:$0xff] %vm233_vm0, %v305_v39  ;;  %339 = vst.msk [vmem:[#allocation2 + $0x159] sm:$0xff] %vm233_vm0, %v306_v42  ;;  %v422_v23 = vld [vmem:[#allocation2 + $0x22] sm:$0xff]  ;;  %v1516_v24 = vld [vmem:[#allocation2 + $0x3a] sm:$0xff]  ;;  %v564_v25 = vmul.f32 %v1468_v46, %v420_v19  ;;  %v804_v27 = vmul.f32 %v1482_v52, %v1509_v12  ;;  %v767_v28 = vadd.f32 %v735_v9, %v699_v15 }
  0x2a   : > { %340 = vst.msk [vmem:[#allocation2 + $0x169] sm:$0xff] %vm233_vm0, %v307_v43  ;;  %341 = vst.msk [vmem:[#allocation2 + $0x171] sm:$0xff] %vm233_vm0, %v308_v44  ;;  %v939_v29 = vadd.f32 %v907_v10, %v871_v16  ;;  %v528_v30 = vadd.f32 %v496_v20, %v460_v14  ;;  %v736_v31 = vmul.f32 %v1479_v51, %v422_v23  ;;  %v1526_v32 = vld [vmem:[%s2326_s2] ss:$0 sm:$0xff]  ;;  %v1532_v37 = vld [vmem:[#allocation2 + $0x48] sm:$0xff] }
  0x2b   : > { %342 = vst.msk [vmem:[#allocation2 + $0x181] sm:$0xff] %vm233_vm0, %v309_v48  ;;  %343 = vst.msk [vmem:[#allocation2 + $0x189] sm:$0xff] %vm233_vm0, %v310_v49  ;;  %v700_v33 = vadd.f32 %v668_v26, %v632_v21  ;;  %v840_v34 = vmul.f32 %v1490_v57, %v1512_v18  ;;  %v908_v36 = vmul.f32 %v1465_v45, %v1516_v24  ;;  %v1535_v44 = vld [vmem:[#allocation2 + $0x49] sm:$0xff]  ;;  %v1563_v6 = vld [vmem:[#allocation2 + $0x51] sm:$0xff] }
  0x2c   : > { %v529_v38 = vadd.f32 %v497_v7, %v461_v0  ;;  %v971_v39 = vadd.f32 %v767_v28, %v595_v22  ;;  %v1009_v42 = vadd.f32 %v1526_v32, %v939_v29  ;;  %v596_v43 = vadd.f32 %v564_v25, %v528_v30  ;;  %v1545_v53 = vld [vmem:[#allocation2 + $0x4a] sm:$0xff]  ;;  %v1569_v15 = vld [vmem:[#allocation2 + $0x52] sm:$0xff]  ;;  %v1583_v29 = vld [vmem:[#allocation2 + $0x60] sm:$0xff] }
  0x2d   : > { %v565_v48 = vmul.f32 %v1468_v46, %v421_v1  ;;  %v768_v49 = vadd.f32 %v736_v31, %v700_v33  ;;  %v872_v50 = vadd.f32 %v840_v34, %v804_v27  ;;  %v633_v55 = vmul.f32 %v1454_v41, %v1486_v54  ;;  %v1557_v4 = vld [vmem:[#allocation2 + $0x50] sm:$0xff]  ;;  %v1590_v34 = vld [vmem:[#allocation2 + $0x61] sm:$0xff] }
  0x2e   : > { %v669_v56 = vmul.f32 %v1471_v47, %v1492_v59  ;;  %v1041_v58 = vadd.f32 %v1009_v42, %v971_v39  ;;  %v737_v61 = vmul.f32 %v1479_v51, %v1499_v2  ;;  %v805_v62 = vmul.f32 %v1482_v52, %v1532_v37 }
  0x2f   : > { %v597_v60 = vadd.f32 %v565_v48, %v529_v38  ;;  %v940_v63 = vadd.f32 %v908_v36, %v872_v50  ;;  %v972_v0 = vadd.f32 %v768_v49, %v596_v43  ;;  %v841_v3 = vmul.f32 %v1490_v57, %v1535_v44  ;;  %v1592_v36 = vld [vmem:[#allocation2 + $0x62] sm:$0xff] }
  0x30   : > { %v701_v1 = vadd.f32 %v669_v56, %v633_v55  ;;  %1073 = vst.msk [vmem:[%s1543_s28] sm:$0xff] %vm233_vm0, %v1041_v58  ;;  %v909_v5 = vmul.f32 %v1465_v45, %v1545_v53  ;;  %v462_v7 = vmul.f32 %v1441_v35, %v350_v11  ;;  %v498_v8 = vmul.f32 %v1451_v40, %v386_v17 }
  0x31   : > { %v566_v9 = vmul.f32 %v1468_v46, %v422_v23  ;;  %v1010_v10 = vadd.f32 %v1526_v32, %v940_v63  ;;  %v873_v14 = vadd.f32 %v841_v3, %v805_v62  ;;  %v634_v16 = vmul.f32 %v1454_v41, %v1509_v12  ;;  %v1613_v63 = vld [vmem:[#allocation2 + $0x68] sm:$0xff] }
  0x32   : > { %v769_v13 = vadd.f32 %v737_v61, %v701_v1  ;;  %v530_v19 = vadd.f32 %v498_v8, %v462_v7  ;;  %v670_v20 = vmul.f32 %v1471_v47, %v1512_v18  ;;  %v738_v11 = vmul.f32 %v1479_v51, %v1516_v24  ;;  %v1621_v8 = vld [vmem:[#allocation2 + $0x6a] sm:$0xff] }
  0x33   : > { %v806_v17 = vmul.f32 %v1482_v52, %v1557_v4  ;;  %v1042_v21 = vadd.f32 %v1010_v10, %v972_v0  ;;  %v941_v22 = vadd.f32 %v909_v5, %v873_v14  ;;  %v842_v25 = vmul.f32 %v1490_v57, %v1563_v6  ;;  %v1615_v0 = vld [vmem:[#allocation2 + $0x69] sm:$0xff] }
  0x34   : > { %v973_v23 = vadd.f32 %v769_v13, %v597_v60  ;;  %v598_v26 = vadd.f32 %v566_v9, %v530_v19  ;;  %v702_v27 = vadd.f32 %v670_v20, %v634_v16  ;;  %v910_v28 = vmul.f32 %v1465_v45, %v1569_v15 }
  0x35   : > { %v463_v30 = vmul.f32 %v1441_v35, %v1486_v54  ;;  %1074 = vst.msk [vmem:[%s1543_s28 + $0x8] sm:$0xff] %vm233_vm0, %v1042_v21  ;;  %v1011_v31 = vadd.f32 %v1526_v32, %v941_v22  ;;  %v874_v33 = vadd.f32 %v842_v25, %v806_v17  ;;  %v499_v38 = vmul.f32 %v1451_v40, %v1492_v59  ;;  %v1639_v22 = vld [vmem:[#allocation2 + $0x78] sm:$0xff] }
  0x36   : > { %v567_v39 = vmul.f32 %v1468_v46, %v1499_v2  ;;  %v770_v42 = vadd.f32 %v738_v11, %v702_v27  ;;  %v635_v54 = vmul.f32 %v1454_v41, %v1532_v37  ;;  %v671_v43 = vmul.f32 %v1471_v47, %v1535_v44  ;;  %v1644_v27 = vld [vmem:[#allocation2 + $0x79] sm:$0xff] }
  0x37   : > { %v739_v48 = vmul.f32 %v1479_v51, %v1545_v53  ;;  %v1043_v49 = vadd.f32 %v1011_v31, %v973_v23  ;;  %v942_v50 = vadd.f32 %v910_v28, %v874_v33  ;;  %v531_v55 = vadd.f32 %v499_v38, %v463_v30  ;;  %v1646_v28 = vld [vmem:[#allocation2 + $0x7a] sm:$0xff] }
  0x38   : > { %v807_v56 = vmul.f32 %v1482_v52, %v1583_v29  ;;  %v974_v59 = vadd.f32 %v770_v42, %v598_v26  ;;  %v703_v58 = vadd.f32 %v671_v43, %v635_v54  ;;  %v843_v2 = vmul.f32 %v1490_v57, %v1590_v34 }
  0x39   : > { %v911_v60 = vmul.f32 %v1465_v45, %v1592_v36  ;;  %1075 = vst.msk [vmem:[%s1543_s28 + $0x10] sm:$0xff] %vm233_vm0, %v1043_v49  ;;  %v1012_v61 = vadd.f32 %v1526_v32, %v942_v50  ;;  %v599_v62 = vadd.f32 %v567_v39, %v531_v55  ;;  %v464_v1 = vmul.f32 %v1441_v35, %v1509_v12 }
  0x3a   : > { %v500_v3 = vmul.f32 %v1451_v40, %v1512_v18  ;;  %v771_v5 = vadd.f32 %v739_v48, %v703_v58  ;;  %v875_v7 = vadd.f32 %v843_v2, %v807_v56  ;;  %v568_v9 = vmul.f32 %v1468_v46, %v1516_v24  ;;  %v1669_v58 = vld [vmem:[#allocation2 + $0x81] sm:$0xff] }
  0x3b   : > { %v636_v10 = vmul.f32 %v1454_v41, %v1557_v4  ;;  %v1044_v13 = vadd.f32 %v1012_v61, %v974_v59  ;;  %v672_v16 = vmul.f32 %v1471_v47, %v1563_v6  ;;  %v740_v12 = vmul.f32 %v1479_v51, %v1569_v15  ;;  %v1667_v59 = vld [vmem:[#allocation2 + $0x80] sm:$0xff] }
  0x3c   : > { %v532_v14 = vadd.f32 %v500_v3, %v464_v1  ;;  %v943_v19 = vadd.f32 %v911_v60, %v875_v7  ;;  %v975_v18 = vadd.f32 %v771_v5, %v599_v62  ;;  %v808_v20 = vmul.f32 %v1482_v52, %v1613_v63  ;;  %v1675_v1 = vld [vmem:[#allocation2 + $0x82] sm:$0xff] }
  0x3d   : > { %v844_v11 = vmul.f32 %v1490_v57, %v1615_v0  ;;  %1076 = vst.msk [vmem:[%s1543_s28 + $0x18] sm:$0xff] %vm233_vm0, %v1044_v13  ;;  %v704_v17 = vadd.f32 %v672_v16, %v636_v10  ;;  %v912_v21 = vmul.f32 %v1465_v45, %v1621_v8  ;;  %v465_v23 = vmul.f32 %v1441_v35, %v1532_v37 }
  0x3e   : > { %v600_v24 = vadd.f32 %v568_v9, %v532_v14  ;;  %v1013_v25 = vadd.f32 %v1526_v32, %v943_v19  ;;  %v501_v30 = vmul.f32 %v1451_v40, %v1535_v44  ;;  %v569_v31 = vmul.f32 %v1468_v46, %v1545_v53 }
  0x3f   : > { %v876_v26 = vadd.f32 %v844_v11, %v808_v20  ;;  %v772_v33 = vadd.f32 %v740_v12, %v704_v17  ;;  %v637_v38 = vmul.f32 %v1454_v41, %v1583_v29  ;;  %v673_v37 = vmul.f32 %v1471_v47, %v1590_v34  ;;  %v1698_v17 = vld [vmem:[#allocation2 + $0x91] sm:$0xff] }
  0x40   : > { %v741_v39 = vmul.f32 %v1479_v51, %v1592_v36  ;;  %v1045_v42 = vadd.f32 %v1013_v25, %v975_v18  ;;  %v533_v43 = vadd.f32 %v501_v30, %v465_v23  ;;  %v809_v48 = vmul.f32 %v1482_v52, %v1639_v22  ;;  %v1693_v18 = vld [vmem:[#allocation2 + $0x90] sm:$0xff] }
  0x41   : > { %v944_v54 = vadd.f32 %v912_v21, %v876_v26  ;;  %v976_v44 = vadd.f32 %v772_v33, %v600_v24  ;;  %v705_v49 = vadd.f32 %v673_v37, %v637_v38  ;;  %v845_v53 = vmul.f32 %v1490_v57, %v1644_v27  ;;  %v1700_v21 = vld [vmem:[#allocation2 + $0x92] sm:$0xff] }
  0x42   : > { %v913_v50 = vmul.f32 %v1465_v45, %v1646_v28  ;;  %1077 = vst.msk [vmem:[%s1543_s28 + $0x20] sm:$0xff] %vm233_vm0, %v1045_v42  ;;  %v601_v56 = vadd.f32 %v569_v31, %v533_v43  ;;  %v466_v2 = vmul.f32 %v1441_v35, %v1557_v4  ;;  %v502_v60 = vmul.f32 %v1451_v40, %v1563_v6 }
  0x43   : > { %v1014_v55 = vadd.f32 %v1526_v32, %v944_v54  ;;  %v773_v61 = vadd.f32 %v741_v39, %v705_v49  ;;  %v877_v62 = vadd.f32 %v845_v53, %v809_v48  ;;  %v570_v3 = vmul.f32 %v1468_v46, %v1569_v15  ;;  %v1723_v49 = vld [vmem:[#allocation2 + $0x99] sm:$0xff] }
  0x44   : > { %v638_v5 = vmul.f32 %v1454_v41, %v1613_v63  ;;  %v534_v9 = vadd.f32 %v502_v60, %v466_v2  ;;  %v674_v10 = vmul.f32 %v1471_v47, %v1615_v0  ;;  %v742_v4 = vmul.f32 %v1479_v51, %v1621_v8  ;;  %v1729_v2 = vld [vmem:[#allocation2 + $0x9a] sm:$0xff] }
  0x45   : > { %v1046_v7 = vadd.f32 %v1014_v55, %v976_v44  ;;  %v945_v13 = vadd.f32 %v913_v50, %v877_v62  ;;  %v977_v6 = vadd.f32 %v773_v61, %v601_v56  ;;  %v810_v14 = vmul.f32 %v1482_v52, %v1667_v59  ;;  %v1721_v44 = vld [vmem:[#allocation2 + $0x98] sm:$0xff] }
  0x46   : > { %v846_v16 = vmul.f32 %v1490_v57, %v1669_v58  ;;  %v602_v15 = vadd.f32 %v570_v3, %v534_v9  ;;  %v706_v12 = vadd.f32 %v674_v10, %v638_v5  ;;  %v914_v19 = vmul.f32 %v1465_v45, %v1675_v1 }
  0x47   : > { %1078 = vst.msk [vmem:[%s1543_s28 + $0x28] sm:$0xff] %vm233_vm0, %v1046_v7  ;;  %v467_v20 = vmul.f32 %v1441_v35, %v1583_v29  ;;  %v1015_v11 = vadd.f32 %v1526_v32, %v945_v13  ;;  %v503_v23 = vmul.f32 %v1451_v40, %v1590_v34  ;;  %v571_v25 = vmul.f32 %v1468_v46, %v1592_v36 }
  0x48   : > { %v878_v24 = vadd.f32 %v846_v16, %v810_v14  ;;  %v774_v26 = vadd.f32 %v742_v4, %v706_v12  ;;  %v639_v30 = vmul.f32 %v1454_v41, %v1639_v22  ;;  %v675_v29 = vmul.f32 %v1471_v47, %v1644_v27  ;;  %v1752_v12 = vld [vmem:[#allocation2 + $0xa9] sm:$0xff] }
  0x49   : > { %v743_v31 = vmul.f32 %v1479_v51, %v1646_v28  ;;  %v1047_v33 = vadd.f32 %v1015_v11, %v977_v6  ;;  %v535_v37 = vadd.f32 %v503_v23, %v467_v20  ;;  %v811_v39 = vmul.f32 %v1482_v52, %v1693_v18  ;;  %v1747_v6 = vld [vmem:[#allocation2 + $0xa8] sm:$0xff] }
  0x4a   : > { %v946_v38 = vadd.f32 %v914_v19, %v878_v24  ;;  %v978_v34 = vadd.f32 %v774_v26, %v602_v15  ;;  %v707_v42 = vadd.f32 %v675_v29, %v639_v30  ;;  %v847_v36 = vmul.f32 %v1490_v57, %v1698_v17  ;;  %v1754_v19 = vld [vmem:[#allocation2 + $0xaa] sm:$0xff] }
  0x4b   : > { %v915_v54 = vmul.f32 %v1465_v45, %v1700_v21  ;;  %1079 = vst.msk [vmem:[%s1543_s28 + $0x30] sm:$0xff] %vm233_vm0, %v1047_v33  ;;  %v603_v48 = vadd.f32 %v571_v25, %v535_v37  ;;  %v468_v53 = vmul.f32 %v1441_v35, %v1613_v63  ;;  %v504_v50 = vmul.f32 %v1451_v40, %v1615_v0 }
  0x4c   : > { %v1016_v43 = vadd.f32 %v1526_v32, %v946_v38  ;;  %v775_v55 = vadd.f32 %v743_v31, %v707_v42  ;;  %v879_v56 = vadd.f32 %v847_v36, %v811_v39  ;;  %v572_v60 = vmul.f32 %v1468_v46, %v1621_v8  ;;  %v1777_v42 = vld [vmem:[#allocation2 + $0xb1] sm:$0xff] }
  0x4d   : > { %v640_v61 = vmul.f32 %v1454_v41, %v1667_v59  ;;  %v536_v3 = vadd.f32 %v504_v50, %v468_v53  ;;  %v676_v5 = vmul.f32 %v1471_v47, %v1669_v58  ;;  %v744_v63 = vmul.f32 %v1479_v51, %v1675_v1  ;;  %v1783_v53 = vld [vmem:[#allocation2 + $0xb2] sm:$0xff] }
  0x4e   : > { %v1048_v62 = vadd.f32 %v1016_v43, %v978_v34  ;;  %v947_v7 = vadd.f32 %v915_v54, %v879_v56  ;;  %v979_v0 = vadd.f32 %v775_v55, %v603_v48  ;;  %v812_v9 = vmul.f32 %v1482_v52, %v1721_v44  ;;  %v1775_v34 = vld [vmem:[#allocation2 + $0xb0] sm:$0xff] }
  0x4f   : > { %v848_v10 = vmul.f32 %v1490_v57, %v1723_v49  ;;  %v604_v8 = vadd.f32 %v572_v60, %v536_v3  ;;  %v708_v4 = vadd.f32 %v676_v5, %v640_v61  ;;  %v916_v13 = vmul.f32 %v1465_v45, %v1729_v2 }
  0x50   : > { %1080 = vst.msk [vmem:[%s1543_s28 + $0x38] sm:$0xff] %vm233_vm0, %v1048_v62  ;;  %v469_v14 = vmul.f32 %v1441_v35, %v1639_v22  ;;  %v1017_v16 = vadd.f32 %v1526_v32, %v947_v7  ;;  %v505_v20 = vmul.f32 %v1451_v40, %v1644_v27  ;;  %v573_v11 = vmul.f32 %v1468_v46, %v1646_v28 }
  0x51   : > { %v880_v15 = vadd.f32 %v848_v10, %v812_v9  ;;  %v776_v24 = vadd.f32 %v744_v63, %v708_v4  ;;  %v641_v23 = vmul.f32 %v1454_v41, %v1693_v18  ;;  %v677_v22 = vmul.f32 %v1471_v47, %v1698_v17  ;;  %v1806_v4 = vld [vmem:[#allocation2 + $0xc1] sm:$0xff] }
  0x52   : > { %v745_v25 = vmul.f32 %v1479_v51, %v1700_v21  ;;  %v1049_v26 = vadd.f32 %v1017_v16, %v979_v0  ;;  %v537_v29 = vadd.f32 %v505_v20, %v469_v14  ;;  %v813_v31 = vmul.f32 %v1482_v52, %v1747_v6  ;;  %v1801_v0 = vld [vmem:[#allocation2 + $0xc0] sm:$0xff] }
  0x53   : > { %v948_v30 = vadd.f32 %v916_v13, %v880_v15  ;;  %v980_v27 = vadd.f32 %v776_v24, %v604_v8  ;;  %v709_v33 = vadd.f32 %v677_v22, %v641_v23  ;;  %v849_v28 = vmul.f32 %v1490_v57, %v1752_v12  ;;  %v1808_v13 = vld [vmem:[#allocation2 + $0xc2] sm:$0xff] }
  0x54   : > { %v917_v38 = vmul.f32 %v1465_v45, %v1754_v19  ;;  %1081 = vst.msk [vmem:[%s1543_s28 + $0x40] sm:$0xff] %vm233_vm0, %v1049_v26  ;;  %v605_v39 = vadd.f32 %v573_v11, %v537_v29  ;;  %v470_v36 = vmul.f32 %v1441_v35, %v1667_v59  ;;  %v506_v54 = vmul.f32 %v1451_v40, %v1669_v58 }
  0x55   : > { %v1018_v37 = vadd.f32 %v1526_v32, %v948_v30  ;;  %v777_v43 = vadd.f32 %v745_v25, %v709_v33  ;;  %v881_v48 = vadd.f32 %v849_v28, %v813_v31  ;;  %v574_v50 = vmul.f32 %v1468_v46, %v1675_v1  ;;  %v1831_v33 = vld [vmem:[#allocation2 + $0xc9] sm:$0xff] }
  0x56   : > { %v642_v55 = vmul.f32 %v1454_v41, %v1721_v44  ;;  %v538_v60 = vadd.f32 %v506_v54, %v470_v36  ;;  %v678_v61 = vmul.f32 %v1471_v47, %v1723_v49  ;;  %v746_v59 = vmul.f32 %v1479_v51, %v1729_v2  ;;  %v1837_v36 = vld [vmem:[#allocation2 + $0xca] sm:$0xff] }
  0x57   : > { %v1050_v56 = vadd.f32 %v1018_v37, %v980_v27  ;;  %v949_v62 = vadd.f32 %v917_v38, %v881_v48  ;;  %v981_v58 = vadd.f32 %v777_v43, %v605_v39  ;;  %v814_v3 = vmul.f32 %v1482_v52, %v1775_v34  ;;  %v1829_v27 = vld [vmem:[#allocation2 + $0xc8] sm:$0xff] }
  0x58   : > { %v850_v5 = vmul.f32 %v1490_v57, %v1777_v42  ;;  %v606_v1 = vadd.f32 %v574_v50, %v538_v60  ;;  %v710_v63 = vadd.f32 %v678_v61, %v642_v55  ;;  %v918_v7 = vmul.f32 %v1465_v45, %v1783_v53 }
  0x59   : > { %1082 = vst.msk [vmem:[%s1543_s28 + $0x48] sm:$0xff] %vm233_vm0, %v1050_v56  ;;  %v471_v9 = vmul.f32 %v1441_v35, %v1693_v18  ;;  %v1019_v10 = vadd.f32 %v1526_v32, %v949_v62  ;;  %v507_v14 = vmul.f32 %v1451_v40, %v1698_v17  ;;  %v575_v16 = vmul.f32 %v1468_v46, %v1700_v21 }
  0x5a   : > { %v882_v8 = vadd.f32 %v850_v5, %v814_v3  ;;  %v778_v15 = vadd.f32 %v746_v59, %v710_v63  ;;  %v643_v20 = vmul.f32 %v1454_v41, %v1747_v6  ;;  %v679_v18 = vmul.f32 %v1471_v47, %v1752_v12  ;;  %v1860_v63 = vld [vmem:[#allocation2 + $0xd9] sm:$0xff] }
  0x5b   : > { %v747_v11 = vmul.f32 %v1479_v51, %v1754_v19  ;;  %v1051_v24 = vadd.f32 %v1019_v10, %v981_v58  ;;  %v539_v22 = vadd.f32 %v507_v14, %v471_v9  ;;  %v815_v25 = vmul.f32 %v1482_v52, %v1801_v0  ;;  %v1855_v58 = vld [vmem:[#allocation2 + $0xd8] sm:$0xff] }
  0x5c   : > { %v950_v23 = vadd.f32 %v918_v7, %v882_v8  ;;  %v982_v17 = vadd.f32 %v778_v15, %v606_v1  ;;  %v711_v26 = vadd.f32 %v679_v18, %v643_v20  ;;  %v851_v21 = vmul.f32 %v1490_v57, %v1806_v4  ;;  %v1862_v7 = vld [vmem:[#allocation2 + $0xda] sm:$0xff] }
  0x5d   : > { %v919_v30 = vmul.f32 %v1465_v45, %v1808_v13  ;;  %1083 = vst.msk [vmem:[%s1543_s28 + $0x50] sm:$0xff] %vm233_vm0, %v1051_v24  ;;  %v607_v31 = vadd.f32 %v575_v16, %v539_v22  ;;  %v472_v28 = vmul.f32 %v1441_v35, %v1721_v44  ;;  %v508_v38 = vmul.f32 %v1451_v40, %v1723_v49 }
  0x5e   : > { %v1020_v29 = vadd.f32 %v1526_v32, %v950_v23  ;;  %v779_v37 = vadd.f32 %v747_v11, %v711_v26  ;;  %v883_v39 = vadd.f32 %v851_v21, %v815_v25  ;;  %v576_v54 = vmul.f32 %v1468_v46, %v1729_v2  ;;  %v1885_v26 = vld [vmem:[#allocation2 + $0xe1] sm:$0xff] }
  0x5f   : > { %v644_v43 = vmul.f32 %v1454_v41, %v1775_v34  ;;  %v540_v50 = vadd.f32 %v508_v38, %v472_v28  ;;  %v680_v55 = vmul.f32 %v1471_v47, %v1777_v42  ;;  %v748_v44 = vmul.f32 %v1479_v51, %v1783_v53  ;;  %v1891_v28 = vld [vmem:[#allocation2 + $0xe2] sm:$0xff] }
  0x60   : > { %v1052_v48 = vadd.f32 %v1020_v29, %v982_v17  ;;  %v951_v56 = vadd.f32 %v919_v30, %v883_v39  ;;  %v983_v49 = vadd.f32 %v779_v37, %v607_v31  ;;  %v816_v60 = vmul.f32 %v1482_v52, %v1829_v27  ;;  %v1883_v17 = vld [vmem:[#allocation2 + $0xe0] sm:$0xff] }
  0x61   : > { %v852_v61 = vmul.f32 %v1490_v57, %v1831_v33  ;;  %v608_v2 = vadd.f32 %v576_v54, %v540_v50  ;;  %v712_v59 = vadd.f32 %v680_v55, %v644_v43  ;;  %v920_v62 = vmul.f32 %v1465_v45, %v1837_v36 }
  0x62   : > { %1084 = vst.msk [vmem:[%s1543_s28 + $0x58] sm:$0xff] %vm233_vm0, %v1052_v48  ;;  %v473_v3 = vmul.f32 %v1441_v35, %v1747_v6  ;;  %v1021_v5 = vadd.f32 %v1526_v32, %v951_v56  ;;  %v509_v9 = vmul.f32 %v1451_v40, %v1752_v12  ;;  %v577_v10 = vmul.f32 %v1468_v46, %v1754_v19 }
  0x63   : > { %v884_v1 = vadd.f32 %v852_v61, %v816_v60  ;;  %v780_v8 = vadd.f32 %v748_v44, %v712_v59  ;;  %v645_v14 = vmul.f32 %v1454_v41, %v1801_v0  ;;  %v681_v6 = vmul.f32 %v1471_v47, %v1806_v4  ;;  %v1914_v59 = vld [vmem:[#allocation2 + $0xf1] sm:$0xff] }
  0x64   : > { %v749_v16 = vmul.f32 %v1479_v51, %v1808_v13  ;;  %v1053_v15 = vadd.f32 %v1021_v5, %v983_v49  ;;  %v541_v18 = vadd.f32 %v509_v9, %v473_v3  ;;  %v817_v11 = vmul.f32 %v1482_v52, %v1855_v58  ;;  %v1909_v49 = vld [vmem:[#allocation2 + $0xf0] sm:$0xff] }
  0x65   : > { %v952_v20 = vadd.f32 %v920_v62, %v884_v1  ;;  %v984_v12 = vadd.f32 %v780_v8, %v608_v2  ;;  %v713_v24 = vadd.f32 %v681_v6, %v645_v14  ;;  %v853_v19 = vmul.f32 %v1490_v57, %v1860_v63  ;;  %v1916_v62 = vld [vmem:[#allocation2 + $0xf2] sm:$0xff] }
  0x66   : > { %v921_v23 = vmul.f32 %v1465_v45, %v1862_v7  ;;  %1085 = vst.msk [vmem:[%s1543_s28 + $0x60] sm:$0xff] %vm233_vm0, %v1053_v15  ;;  %v609_v25 = vadd.f32 %v577_v10, %v541_v18  ;;  %v474_v21 = vmul.f32 %v1441_v35, %v1775_v34  ;;  %v510_v30 = vmul.f32 %v1451_v40, %v1777_v42 }
  0x67   : > { %v1022_v22 = vadd.f32 %v1526_v32, %v952_v20  ;;  %v781_v29 = vadd.f32 %v749_v16, %v713_v24  ;;  %v885_v31 = vadd.f32 %v853_v19, %v817_v11  ;;  %v578_v38 = vmul.f32 %v1468_v46, %v1783_v53  ;;  %v1939_v24 = vld [vmem:[#allocation2 + $0xf9] sm:$0xff] }
  0x68   : > { %v646_v37 = vmul.f32 %v1454_v41, %v1829_v27  ;;  %v542_v54 = vadd.f32 %v510_v30, %v474_v21  ;;  %v682_v43 = vmul.f32 %v1471_v47, %v1831_v33  ;;  %v750_v34 = vmul.f32 %v1479_v51, %v1837_v36  ;;  %v1945_v21 = vld [vmem:[#allocation2 + $0xfa] sm:$0xff] }
  0x69   : > { %v1054_v39 = vadd.f32 %v1022_v22, %v984_v12  ;;  %v953_v48 = vadd.f32 %v921_v23, %v885_v31  ;;  %v985_v42 = vadd.f32 %v781_v29, %v609_v25  ;;  %v818_v50 = vmul.f32 %v1482_v52, %v1883_v17  ;;  %v1937_v12 = vld [vmem:[#allocation2 + $0xf8] sm:$0xff] }
  0x6a   : > { %v854_v55 = vmul.f32 %v1490_v57, %v1885_v26  ;;  %v610_v53 = vadd.f32 %v578_v38, %v542_v54  ;;  %v714_v44 = vadd.f32 %v682_v43, %v646_v37  ;;  %v922_v56 = vmul.f32 %v1465_v45, %v1891_v28 }
  0x6b   : > { %1086 = vst.msk [vmem:[%s1543_s28 + $0x68] sm:$0xff] %vm233_vm0, %v1054_v39  ;;  %v475_v60 = vmul.f32 %v1441_v35, %v1801_v0  ;;  %v1023_v61 = vadd.f32 %v1526_v32, %v953_v48  ;;  %v511_v3 = vmul.f32 %v1451_v40, %v1806_v4  ;;  %v579_v5 = vmul.f32 %v1468_v46, %v1808_v13 }
  0x6c   : > { %v886_v2 = vadd.f32 %v854_v55, %v818_v50  ;;  %v782_v1 = vadd.f32 %v750_v34, %v714_v44  ;;  %v647_v9 = vmul.f32 %v1454_v41, %v1855_v58  ;;  %v683_v0 = vmul.f32 %v1471_v47, %v1860_v63  ;;  %v1968_v44 = vld [vmem:[#allocation2 + $0x109] sm:$0xff] }
  0x6d   : > { %v751_v10 = vmul.f32 %v1479_v51, %v1862_v7  ;;  %v1055_v8 = vadd.f32 %v1023_v61, %v985_v42  ;;  %v543_v6 = vadd.f32 %v511_v3, %v475_v60  ;;  %v819_v16 = vmul.f32 %v1482_v52, %v1909_v49  ;;  %v1963_v42 = vld [vmem:[#allocation2 + $0x108] sm:$0xff] }
  0x6e   : > { %v954_v14 = vadd.f32 %v922_v56, %v886_v2  ;;  %v986_v4 = vadd.f32 %v782_v1, %v610_v53  ;;  %v715_v15 = vadd.f32 %v683_v0, %v647_v9  ;;  %v855_v13 = vmul.f32 %v1490_v57, %v1914_v59  ;;  %v1970_v56 = vld [vmem:[#allocation2 + $0x10a] sm:$0xff] }
  0x6f   : > { %v923_v20 = vmul.f32 %v1465_v45, %v1916_v62  ;;  %1087 = vst.msk [vmem:[%s1543_s28 + $0x70] sm:$0xff] %vm233_vm0, %v1055_v8  ;;  %v611_v11 = vadd.f32 %v579_v5, %v543_v6  ;;  %v476_v19 = vmul.f32 %v1441_v35, %v1829_v27  ;;  %v512_v23 = vmul.f32 %v1451_v40, %v1831_v33 }
  0x70   : > { %v1024_v18 = vadd.f32 %v1526_v32, %v954_v14  ;;  %v783_v22 = vadd.f32 %v751_v10, %v715_v15  ;;  %v887_v25 = vadd.f32 %v855_v13, %v819_v16  ;;  %v580_v30 = vmul.f32 %v1468_v46, %v1837_v36  ;;  %v1993_v15 = vld [vmem:[#allocation2 + $0x111] sm:$0xff] }
  0x71   : > { %v648_v29 = vmul.f32 %v1454_v41, %v1883_v17  ;;  %v544_v38 = vadd.f32 %v512_v23, %v476_v19  ;;  %v684_v37 = vmul.f32 %v1471_v47, %v1885_v26  ;;  %v752_v27 = vmul.f32 %v1479_v51, %v1891_v28  ;;  %v1999_v19 = vld [vmem:[#allocation2 + $0x112] sm:$0xff] }
  0x72   : > { %v1056_v31 = vadd.f32 %v1024_v18, %v986_v4  ;;  %v955_v39 = vadd.f32 %v923_v20, %v887_v25  ;;  %v987_v33 = vadd.f32 %v783_v22, %v611_v11  ;;  %v820_v54 = vmul.f32 %v1482_v52, %v1937_v12  ;;  %v1991_v4 = vld [vmem:[#allocation2 + $0x110] sm:$0xff] }
  0x73   : > { %v856_v43 = vmul.f32 %v1490_v57, %v1939_v24  ;;  %v612_v36 = vadd.f32 %v580_v30, %v544_v38  ;;  %v716_v34 = vadd.f32 %v684_v37, %v648_v29  ;;  %v924_v48 = vmul.f32 %v1465_v45, %v1945_v21 }
  0x74   : > { %1088 = vst.msk [vmem:[%s1543_s28 + $0x78] sm:$0xff] %vm233_vm0, %v1056_v31  ;;  %v477_v50 = vmul.f32 %v1441_v35, %v1855_v58  ;;  %v1025_v55 = vadd.f32 %v1526_v32, %v955_v39  ;;  %v513_v60 = vmul.f32 %v1451_v40, %v1860_v63  ;;  %v581_v61 = vmul.f32 %v1468_v46, %v1862_v7 }
  0x75   : > { %v888_v53 = vadd.f32 %v856_v43, %v820_v54  ;;  %v784_v2 = vadd.f32 %v752_v27, %v716_v34  ;;  %v649_v3 = vmul.f32 %v1454_v41, %v1909_v49  ;;  %v685_v58 = vmul.f32 %v1471_v47, %v1914_v59  ;;  %v2022_v34 = vld [vmem:[#allocation2 + $0x121] sm:$0xff] }
  0x76   : > { %v753_v5 = vmul.f32 %v1479_v51, %v1916_v62  ;;  %v1057_v1 = vadd.f32 %v1025_v55, %v987_v33  ;;  %v545_v0 = vadd.f32 %v513_v60, %v477_v50  ;;  %v821_v10 = vmul.f32 %v1482_v52, %v1963_v42  ;;  %v2017_v33 = vld [vmem:[#allocation2 + $0x120] sm:$0xff] }
  0x77   : > { %v956_v9 = vadd.f32 %v924_v48, %v888_v53  ;;  %v988_v63 = vadd.f32 %v784_v2, %v612_v36  ;;  %v717_v8 = vadd.f32 %v685_v58, %v649_v3  ;;  %v857_v7 = vmul.f32 %v1490_v57, %v1968_v44  ;;  %v2024_v48 = vld [vmem:[#allocation2 + $0x122] sm:$0xff] }
  0x78   : > { %v925_v14 = vmul.f32 %v1465_v45, %v1970_v56  ;;  %1089 = vst.msk [vmem:[%s1543_s28 + $0x80] sm:$0xff] %vm233_vm0, %v1057_v1  ;;  %v613_v16 = vadd.f32 %v581_v61, %v545_v0  ;;  %v478_v13 = vmul.f32 %v1441_v35, %v1883_v17  ;;  %v514_v20 = vmul.f32 %v1451_v40, %v1885_v26 }
  0x79   : > { %v1026_v6 = vadd.f32 %v1526_v32, %v956_v9  ;;  %v785_v18 = vadd.f32 %v753_v5, %v717_v8  ;;  %v889_v11 = vadd.f32 %v857_v7, %v821_v10  ;;  %v582_v23 = vmul.f32 %v1468_v46, %v1891_v28  ;;  %v2047_v8 = vld [vmem:[#allocation2 + $0x129] sm:$0xff] }
  0x7a   : > { %v650_v22 = vmul.f32 %v1454_v41, %v1937_v12  ;;  %v546_v30 = vadd.f32 %v514_v20, %v478_v13  ;;  %v686_v29 = vmul.f32 %v1471_v47, %v1939_v24  ;;  %v754_v17 = vmul.f32 %v1479_v51, %v1945_v21  ;;  %v2053_v13 = vld [vmem:[#allocation2 + $0x12a] sm:$0xff] }
  0x7b   : > { %v1058_v25 = vadd.f32 %v1026_v6, %v988_v63  ;;  %v957_v31 = vadd.f32 %v925_v14, %v889_v11  ;;  %v989_v26 = vadd.f32 %v785_v18, %v613_v16  ;;  %v822_v38 = vmul.f32 %v1482_v52, %v1991_v4  ;;  %v2045_v63 = vld [vmem:[#allocation2 + $0x128] sm:$0xff] }
  0x7c   : > { %v858_v37 = vmul.f32 %v1490_v57, %v1993_v15  ;;  %v614_v28 = vadd.f32 %v582_v23, %v546_v30  ;;  %v718_v27 = vadd.f32 %v686_v29, %v650_v22  ;;  %v926_v39 = vmul.f32 %v1465_v45, %v1999_v19 }
  0x7d   : > { %1090 = vst.msk [vmem:[%s1543_s28 + $0x88] sm:$0xff] %vm233_vm0, %v1058_v25  ;;  %v479_v54 = vmul.f32 %v1441_v35, %v1909_v49  ;;  %v1027_v43 = vadd.f32 %v1526_v32, %v957_v31  ;;  %v515_v50 = vmul.f32 %v1451_v40, %v1914_v59  ;;  %v583_v55 = vmul.f32 %v1468_v46, %v1916_v62 }
  0x7e   : > { %v890_v36 = vadd.f32 %v858_v37, %v822_v38  ;;  %v786_v53 = vadd.f32 %v754_v17, %v718_v27  ;;  %v651_v60 = vmul.f32 %v1454_v41, %v1963_v42  ;;  %v687_v49 = vmul.f32 %v1471_v47, %v1968_v44  ;;  %v2076_v27 = vld [vmem:[#allocation2 + $0x139] sm:$0xff] }
  0x7f   : > { %v755_v61 = vmul.f32 %v1479_v51, %v1970_v56  ;;  %v1059_v2 = vadd.f32 %v1027_v43, %v989_v26  ;;  %v547_v58 = vadd.f32 %v515_v50, %v479_v54  ;;  %v823_v5 = vmul.f32 %v1482_v52, %v2017_v33  ;;  %v2071_v26 = vld [vmem:[#allocation2 + $0x138] sm:$0xff] }
  0x80   : > { %v958_v3 = vadd.f32 %v926_v39, %v890_v36  ;;  %v990_v59 = vadd.f32 %v786_v53, %v614_v28  ;;  %v719_v1 = vadd.f32 %v687_v49, %v651_v60  ;;  %v859_v62 = vmul.f32 %v1490_v57, %v2022_v34  ;;  %v2078_v39 = vld [vmem:[#allocation2 + $0x13a] sm:$0xff] }
  0x81   : > { %v927_v9 = vmul.f32 %v1465_v45, %v2024_v48  ;;  %1091 = vst.msk [vmem:[%s1543_s28 + $0x90] sm:$0xff] %vm233_vm0, %v1059_v2  ;;  %v615_v10 = vadd.f32 %v583_v55, %v547_v58  ;;  %v480_v7 = vmul.f32 %v1441_v35, %v1937_v12  ;;  %v516_v14 = vmul.f32 %v1451_v40, %v1939_v24  ;;  %v2097_v2 = vld [vmem:[%s2325_s1 + $0x8] ss:$0 sm:$0xff] }
  0x82   : > { %v1028_v0 = vadd.f32 %v1526_v32, %v958_v3  ;;  %v787_v6 = vadd.f32 %v755_v61, %v719_v1  ;;  %v891_v16 = vadd.f32 %v859_v62, %v823_v5  ;;  %v584_v20 = vmul.f32 %v1468_v46, %v1945_v21  ;;  %v2106_v1 = vld [vmem:[#allocation2 + $0x141] sm:$0xff] }
  0x83   : > { %v652_v18 = vmul.f32 %v1454_v41, %v1991_v4  ;;  %v548_v23 = vadd.f32 %v516_v14, %v480_v7  ;;  %v688_v22 = vmul.f32 %v1471_v47, %v1993_v15  ;;  %v756_v12 = vmul.f32 %v1479_v51, %v1999_v19  ;;  %v2112_v7 = vld [vmem:[#allocation2 + $0x142] sm:$0xff] }
  0x84   : > { %v1060_v11 = vadd.f32 %v1028_v0, %v990_v59  ;;  %v959_v25 = vadd.f32 %v927_v9, %v891_v16  ;;  %v991_v24 = vadd.f32 %v787_v6, %v615_v10  ;;  %v824_v30 = vmul.f32 %v1482_v52, %v2045_v63  ;;  %v2104_v59 = vld [vmem:[#allocation2 + $0x140] sm:$0xff] }
  0x85   : > { %v860_v29 = vmul.f32 %v1490_v57, %v2047_v8  ;;  %v616_v21 = vadd.f32 %v584_v20, %v548_v23  ;;  %v720_v17 = vadd.f32 %v688_v22, %v652_v18  ;;  %v928_v31 = vmul.f32 %v1465_v45, %v2053_v13 }
  0x86   : > { %1092 = vst.msk [vmem:[%s1543_s28 + $0x98] sm:$0xff] %vm233_vm0, %v1060_v11  ;;  %v481_v38 = vmul.f32 %v1441_v35, %v1963_v42  ;;  %v1029_v37 = vadd.f32 %v1526_v32, %v959_v25  ;;  %v517_v54 = vmul.f32 %v1451_v40, %v1968_v44  ;;  %v585_v43 = vmul.f32 %v1468_v46, %v1970_v56 }
  0x87   : > { %v892_v28 = vadd.f32 %v860_v29, %v824_v30  ;;  %v788_v45 = vadd.f32 %v756_v12, %v720_v17  ;;  %v653_v36 = vmul.f32 %v1454_v41, %v2017_v33  ;;  %v689_v42 = vmul.f32 %v1471_v47, %v2022_v34  ;;  %v2135_v17 = vld [vmem:[#allocation2 + $0x151] sm:$0xff] }
  0x88   : > { %v757_v50 = vmul.f32 %v1479_v51, %v2024_v48  ;;  %v1061_v55 = vadd.f32 %v1029_v37, %v991_v24  ;;  %v549_v60 = vadd.f32 %v517_v54, %v481_v38  ;;  %v825_v49 = vmul.f32 %v1482_v52, %v2071_v26  ;;  %v2130_v24 = vld [vmem:[#allocation2 + $0x150] sm:$0xff] }
  0x89   : > { %v960_v53 = vadd.f32 %v928_v31, %v892_v28  ;;  %v992_v44 = vadd.f32 %v788_v45, %v616_v21  ;;  %v721_v61 = vadd.f32 %v689_v42, %v653_v36  ;;  %v861_v56 = vmul.f32 %v1490_v57, %v2076_v27  ;;  %v2137_v31 = vld [vmem:[#allocation2 + $0x152] sm:$0xff] }
  0x8a   : > { %v929_v3 = vmul.f32 %v2097_v2, %v2078_v39  ;;  %1093 = vst.msk [vmem:[%s1543_s28 + $0xa0] sm:$0xff] %vm233_vm0, %v1061_v55  ;;  %v617_v5 = vadd.f32 %v585_v43, %v549_v60  ;;  %v482_v62 = vmul.f32 %v1441_v35, %v1991_v4  ;;  %v518_v9 = vmul.f32 %v1451_v40, %v1993_v15 }
  0x8b   : > { %v1030_v58 = vadd.f32 %v1526_v32, %v960_v53  ;;  %v789_v0 = vadd.f32 %v757_v50, %v721_v61  ;;  %v893_v10 = vadd.f32 %v861_v56, %v825_v49  ;;  %v586_v14 = vmul.f32 %v1468_v46, %v1999_v19  ;;  %v2160_v61 = vld [vmem:[#allocation2 + $0x159] sm:$0xff] }
  0x8c   : > { %v654_v6 = vmul.f32 %v1454_v41, %v2045_v63  ;;  %v550_v20 = vadd.f32 %v518_v9, %v482_v62  ;;  %v690_v18 = vmul.f32 %v1471_v47, %v2047_v8  ;;  %v758_v4 = vmul.f32 %v1479_v51, %v2053_v13  ;;  %v2166_v62 = vld [vmem:[#allocation2 + $0x15a] sm:$0xff] }
  0x8d   : > { %v1062_v16 = vadd.f32 %v1030_v58, %v992_v44  ;;  %v961_v11 = vadd.f32 %v929_v3, %v893_v10  ;;  %v993_v15 = vadd.f32 %v789_v0, %v617_v5  ;;  %v826_v23 = vmul.f32 %v1482_v52, %v2104_v59  ;;  %v2158_v44 = vld [vmem:[#allocation2 + $0x158] sm:$0xff] }
  0x8e   : > { %v862_v22 = vmul.f32 %v1490_v57, %v2106_v1  ;;  %v618_v19 = vadd.f32 %v586_v14, %v550_v20  ;;  %v722_v12 = vadd.f32 %v690_v18, %v654_v6  ;;  %v930_v25 = vmul.f32 %v2097_v2, %v2112_v7 }
  0x8f   : > { %1094 = vst.msk [vmem:[%s1543_s28 + $0xa8] sm:$0xff] %vm233_vm0, %v1062_v16  ;;  %v483_v30 = vmul.f32 %v1441_v35, %v2017_v33  ;;  %v1031_v29 = vadd.f32 %v1526_v32, %v961_v11  ;;  %v519_v38 = vmul.f32 %v1451_v40, %v2022_v34  ;;  %v587_v37 = vmul.f32 %v1468_v46, %v2024_v48  ;;  %v2184_v11 = vld [vmem:[#allocation2 + $0x168] sm:$0xff] }
  0x90   : > { %v894_v21 = vadd.f32 %v862_v22, %v826_v23  ;;  %v790_v28 = vadd.f32 %v758_v4, %v722_v12  ;;  %v655_v54 = vmul.f32 %v1454_v41, %v2071_v26  ;;  %v691_v33 = vmul.f32 %v1471_v47, %v2076_v27  ;;  %v2191_v23 = vld [vmem:[%s2326_s2] ss:$0 sm:$0xff]  ;;  %v2194_v12 = vld [vmem:[#allocation2 + $0x169] sm:$0xff] }
  0x91   : > { %v759_v43 = vmul.f32 %v1479_v51, %v2078_v39  ;;  %v1063_v45 = vadd.f32 %v1031_v29, %v993_v15  ;;  %v551_v42 = vadd.f32 %v519_v38, %v483_v30  ;;  %v827_v50 = vmul.f32 %v1482_v52, %v2130_v24 }
  0x92   : > { %v962_v36 = vadd.f32 %v930_v25, %v894_v21  ;;  %v994_v34 = vadd.f32 %v790_v28, %v618_v19  ;;  %v723_v55 = vadd.f32 %v691_v33, %v655_v54  ;;  %v863_v48 = vmul.f32 %v1490_v57, %v2135_v17  ;;  %v2196_v25 = vld [vmem:[#allocation2 + $0x16a] sm:$0xff] }
  0x93   : > { %v931_v53 = vmul.f32 %v2097_v2, %v2137_v31  ;;  %1095 = vst.msk [vmem:[%s1543_s28 + $0xb0] sm:$0xff] %vm233_vm0, %v1063_v45  ;;  %v619_v49 = vadd.f32 %v587_v37, %v551_v42  ;;  %v484_v56 = vmul.f32 %v1441_v35, %v2045_v63  ;;  %v520_v3 = vmul.f32 %v1451_v40, %v2047_v8 }
  0x94   : > { %v1032_v60 = vadd.f32 %v1526_v32, %v962_v36  ;;  %v791_v58 = vadd.f32 %v759_v43, %v723_v55  ;;  %v895_v5 = vadd.f32 %v863_v48, %v827_v50  ;;  %v588_v9 = vmul.f32 %v1468_v46, %v2053_v13  ;;  %v2219_v55 = vld [vmem:[#allocation2 + $0x171] sm:$0xff] }
  0x95   : > { %v656_v32 = vmul.f32 %v1454_v41, %v2104_v59  ;;  %v552_v10 = vadd.f32 %v520_v3, %v484_v56  ;;  %v692_v14 = vmul.f32 %v1471_v47, %v2106_v1  ;;  %v760_v63 = vmul.f32 %v1479_v51, %v2112_v7  ;;  %v2225_v56 = vld [vmem:[#allocation2 + $0x172] sm:$0xff] }
  0x96   : > { %v1064_v0 = vadd.f32 %v1032_v60, %v994_v34  ;;  %v963_v6 = vadd.f32 %v931_v53, %v895_v5  ;;  %v995_v8 = vadd.f32 %v791_v58, %v619_v49  ;;  %v828_v16 = vmul.f32 %v1482_v52, %v2158_v44  ;;  %v2217_v34 = vld [vmem:[#allocation2 + $0x170] sm:$0xff] }
  0x97   : > { %v864_v20 = vmul.f32 %v1490_v57, %v2160_v61  ;;  %v620_v13 = vadd.f32 %v588_v9, %v552_v10  ;;  %v724_v18 = vadd.f32 %v692_v14, %v656_v32  ;;  %v932_v4 = vmul.f32 %v2097_v2, %v2166_v62 }
  0x98   : > { %1096 = vst.msk [vmem:[%s1543_s28 + $0xb8] sm:$0xff] %vm233_vm0, %v1064_v0  ;;  %v485_v15 = vmul.f32 %v1441_v35, %v2071_v26  ;;  %v1033_v22 = vadd.f32 %v2191_v23, %v963_v6  ;;  %v521_v30 = vmul.f32 %v1451_v40, %v2076_v27  ;;  %v589_v29 = vmul.f32 %v1468_v46, %v2078_v39 }
  0x99   : > { %v896_v19 = vadd.f32 %v864_v20, %v828_v16  ;;  %v792_v26 = vadd.f32 %v760_v63, %v724_v18  ;;  %v657_v21 = vmul.f32 %v1454_v41, %v2130_v24  ;;  %v693_v38 = vmul.f32 %v1471_v47, %v2135_v17  ;;  %v415_v18 = vld [vmem:[#allocation2 + $0x181] sm:$0xff] }
  0x9a   : > { %v761_v37 = vmul.f32 %v1479_v51, %v2137_v31  ;;  %v1065_v28 = vadd.f32 %v1033_v22, %v995_v8  ;;  %v553_v33 = vadd.f32 %v521_v30, %v485_v15  ;;  %v829_v43 = vmul.f32 %v1482_v52, %v2184_v11  ;;  %v379_v8 = vld [vmem:[#allocation2 + $0x180] sm:$0xff] }
  0x9b   : > { %v964_v54 = vadd.f32 %v932_v4, %v896_v19  ;;  %v996_v27 = vadd.f32 %v792_v26, %v620_v13  ;;  %v725_v45 = vadd.f32 %v693_v38, %v657_v21  ;;  %v865_v39 = vmul.f32 %v1490_v57, %v2194_v12  ;;  %v451_v4 = vld [vmem:[#allocation2 + $0x182] sm:$0xff] }
  0x9c   : > { %v933_v36 = vmul.f32 %v2097_v2, %v2196_v25  ;;  %1097 = vst.msk [vmem:[%s1543_s28 + $0xc0] sm:$0xff] %vm233_vm0, %v1065_v28  ;;  %v621_v50 = vadd.f32 %v589_v29, %v553_v33  ;;  %v486_v48 = vmul.f32 %v1441_v35, %v2104_v59  ;;  %v522_v53 = vmul.f32 %v1451_v40, %v2106_v1 }
  0x9d   : > { %v1034_v42 = vadd.f32 %v2191_v23, %v964_v54  ;;  %v793_v60 = vadd.f32 %v761_v37, %v725_v45  ;;  %v897_v49 = vadd.f32 %v865_v39, %v829_v43  ;;  %v590_v3 = vmul.f32 %v1468_v46, %v2112_v7  ;;  %v416_v45 = vld [vmem:[#allocation2 + $0x189] sm:$0xff] }
  0x9e   : > { %v658_v58 = vmul.f32 %v1454_v41, %v2158_v44  ;;  %v554_v9 = vadd.f32 %v522_v53, %v486_v48  ;;  %v694_v32 = vmul.f32 %v1471_v47, %v2160_v61  ;;  %v762_v59 = vmul.f32 %v1479_v51, %v2166_v62  ;;  %v452_v48 = vld [vmem:[#allocation2 + $0x18a] sm:$0xff] }
  0x9f   : > { %v1066_v5 = vadd.f32 %v1034_v42, %v996_v27  ;;  %v965_v0 = vadd.f32 %v933_v36, %v897_v49  ;;  %v997_v1 = vadd.f32 %v793_v60, %v621_v50  ;;  %v830_v10 = vmul.f32 %v1482_v52, %v2217_v34  ;;  %v380_v27 = vld [vmem:[#allocation2 + $0x188] sm:$0xff] }
  0xa0   : > { %v866_v14 = vmul.f32 %v1490_v57, %v2219_v55  ;;  %v622_v7 = vadd.f32 %v590_v3, %v554_v9  ;;  %v726_v63 = vadd.f32 %v694_v32, %v658_v58  ;;  %v934_v6 = vmul.f32 %v2097_v2, %v2225_v56 }
  0xa1   : > { %1098 = vst.msk [vmem:[%s1543_s28 + $0xc8] sm:$0xff] %vm233_vm0, %v1066_v5  ;;  %v487_v16 = vmul.f32 %v1441_v35, %v2130_v24  ;;  %v1035_v20 = vadd.f32 %v2191_v23, %v965_v0  ;;  %v523_v15 = vmul.f32 %v1451_v40, %v2135_v17  ;;  %v591_v22 = vmul.f32 %v1468_v46, %v2137_v31 }
  0xa2   : > { %v898_v13 = vadd.f32 %v866_v14, %v830_v10  ;;  %v794_v19 = vadd.f32 %v762_v59, %v726_v63  ;;  %v659_v30 = vmul.f32 %v1454_v41, %v2184_v11  ;;  %v695_v29 = vmul.f32 %v1471_v47, %v2194_v12  ;;  %v417_v63 = vld [vmem:[#allocation2 + $0x199] sm:$0xff] }
  0xa3   : > { %v763_v24 = vmul.f32 %v1479_v51, %v2196_v25  ;;  %v1067_v26 = vadd.f32 %v1035_v20, %v997_v1  ;;  %v555_v38 = vadd.f32 %v523_v15, %v487_v16  ;;  %v831_v37 = vmul.f32 %v1482_v52, %v379_v8  ;;  %v381_v1 = vld [vmem:[#allocation2 + $0x198] sm:$0xff] }
  0xa4   : > { %v966_v21 = vadd.f32 %v934_v6, %v898_v13  ;;  %v998_v28 = vadd.f32 %v794_v19, %v622_v7  ;;  %v727_v17 = vadd.f32 %v695_v29, %v659_v30  ;;  %v867_v54 = vmul.f32 %v1490_v57, %v415_v18  ;;  %v453_v6 = vld [vmem:[#allocation2 + $0x19a] sm:$0xff] }
  0xa5   : > { %v935_v31 = vmul.f32 %v2097_v2, %v451_v4  ;;  %1099 = vst.msk [vmem:[%s1543_s28 + $0xd0] sm:$0xff] %vm233_vm0, %v1067_v26  ;;  %v623_v43 = vadd.f32 %v591_v22, %v555_v38  ;;  %v488_v39 = vmul.f32 %v1441_v35, %v2158_v44  ;;  %v524_v36 = vmul.f32 %v1451_v40, %v2160_v61 }
  0xa6   : > { %v1036_v33 = vadd.f32 %v2191_v23, %v966_v21  ;;  %v795_v42 = vadd.f32 %v763_v24, %v727_v17  ;;  %v899_v50 = vadd.f32 %v867_v54, %v831_v37  ;;  %v592_v53 = vmul.f32 %v1468_v46, %v2166_v62  ;;  %v382_v37 = vld [vmem:[#allocation2 + $0x1a0] sm:$0xff] }
  0xa7   : > { %v660_v60 = vmul.f32 %v1454_v41, %v2217_v34  ;;  %v556_v3 = vadd.f32 %v524_v36, %v488_v39  ;;  %v696_v58 = vmul.f32 %v1471_v47, %v2219_v55  ;;  %v764_v44 = vmul.f32 %v1479_v51, %v2225_v56 }
  0xa8   : > { %v1068_v49 = vadd.f32 %v1036_v33, %v998_v28  ;;  %v967_v5 = vadd.f32 %v935_v31, %v899_v50  ;;  %v999_v9 = vadd.f32 %v795_v42, %v623_v43  ;;  %v832_v61 = vmul.f32 %v1482_v52, %v380_v27  ;;  %v454_v31 = vld [vmem:[#allocation2 + $0x1a2] sm:$0xff] }
  0xa9   : > { %v868_v32 = vmul.f32 %v1490_v57, %v416_v45  ;;  %v624_v62 = vadd.f32 %v592_v53, %v556_v3  ;;  %v728_v59 = vadd.f32 %v696_v58, %v660_v60  ;;  %v936_v0 = vmul.f32 %v2097_v2, %v452_v48 }
  0xaa   : > { %1100 = vst.msk [vmem:[%s1543_s28 + $0xd8] sm:$0xff] %vm233_vm0, %v1068_v49  ;;  %v489_v10 = vmul.f32 %v1441_v35, %v2184_v11  ;;  %v1037_v14 = vadd.f32 %v2191_v23, %v967_v5  ;;  %v525_v16 = vmul.f32 %v1451_v40, %v2194_v12  ;;  %v593_v20 = vmul.f32 %v1468_v46, %v2196_v25 }
  0xab   : > { %v900_v7 = vadd.f32 %v868_v32, %v832_v61  ;;  %v796_v13 = vadd.f32 %v764_v44, %v728_v59  ;;  %v661_v15 = vmul.f32 %v1454_v41, %v379_v8  ;;  %v697_v22 = vmul.f32 %v1471_v47, %v415_v18  ;;  %v418_v18 = vld [vmem:[#allocation2 + $0x1a1] sm:$0xff] }
  0xac   : > { %v765_v19 = vmul.f32 %v1479_v51, %v451_v4  ;;  %v1069_v11 = vadd.f32 %v1037_v14, %v999_v9  ;;  %v557_v29 = vadd.f32 %v525_v16, %v489_v10  ;;  %v833_v24 = vmul.f32 %v1482_v52, %v381_v1 }
  0xad   : > { %v968_v30 = vadd.f32 %v936_v0, %v900_v7  ;;  %v1000_v26 = vadd.f32 %v796_v13, %v624_v62  ;;  %v729_v21 = vadd.f32 %v697_v22, %v661_v15  ;;  %v869_v38 = vmul.f32 %v1490_v57, %v417_v63 }
  0xae   : > { %v937_v12 = vmul.f32 %v2097_v2, %v453_v6  ;;  %1101 = vst.msk [vmem:[%s1543_s28 + $0xe0] sm:$0xff] %vm233_vm0, %v1069_v11  ;;  %v625_v8 = vadd.f32 %v593_v20, %v557_v29  ;;  %v490_v4 = vmul.f32 %v1441_v35, %v2217_v34  ;;  %v526_v28 = vmul.f32 %v1451_v40, %v2219_v55 }
  0xaf   : > { %v1038_v25 = vadd.f32 %v2191_v23, %v968_v30  ;;  %v797_v17 = vadd.f32 %v765_v19, %v729_v21  ;;  %v901_v54 = vadd.f32 %v869_v38, %v833_v24  ;;  %v662_v33 = vmul.f32 %v1454_v41, %v380_v27 }
  0xb0   : > { %v558_v39 = vadd.f32 %v526_v28, %v490_v4  ;;  %v594_v36 = vmul.f32 %v1468_v46, %v2225_v56  ;;  %v698_v42 = vmul.f32 %v1471_v47, %v416_v45  ;;  %v834_v35 = vmul.f32 %v1482_v52, %v382_v37 }
  0xb1   : > { %v1070_v43 = vadd.f32 %v1038_v25, %v1000_v26  ;;  %v969_v50 = vadd.f32 %v937_v12, %v901_v54  ;;  %v1001_v53 = vadd.f32 %v797_v17, %v625_v8  ;;  %v870_v40 = vmul.f32 %v1490_v57, %v418_v18 }
  0xb2   : > { %v626_v34 = vadd.f32 %v594_v36, %v558_v39  ;;  %v730_v55 = vadd.f32 %v698_v42, %v662_v33  ;;  %v766_v41 = vmul.f32 %v1479_v51, %v452_v48  ;;  %v938_v27 = vmul.f32 %v2097_v2, %v454_v31 }
  0xb3   : > { %1102 = vst.msk [vmem:[%s1543_s28 + $0xe8] sm:$0xff] %vm233_vm0, %v1070_v43  ;;  %v1039_v46 = vadd.f32 %v2191_v23, %v969_v50  ;;  %v902_v56 = vadd.f32 %v870_v40, %v834_v35 }
  0xb4   : > { %v798_v47 = vadd.f32 %v766_v41, %v730_v55 }
  0xb5   : > { %v1071_v45 = vadd.f32 %v1039_v46, %v1001_v53  ;;  %v970_v60 = vadd.f32 %v938_v27, %v902_v56 }
  0xb6   : > { %v1002_v49 = vadd.f32 %v798_v47, %v626_v34 }
  0xb7   : > { %1103 = vst.msk [vmem:[%s1543_s28 + $0xf0] sm:$0xff] %vm233_vm0, %v1071_v45  ;;  %v1040_v52 = vadd.f32 %v2191_v23, %v970_v60 }
  0xb9   : > { %v1072_v57 = vadd.f32 %v1040_v52, %v1002_v49 }
  0xbb   : > { %1104 = vst.msk [vmem:[%s1543_s28 + $0xf8] sm:$0xff] %vm233_vm0, %v1072_v57 }
  0xbc PF: > { %s13_s14 = sadd.s32 1, %s1282_s14   ;;  %s2328_s12 = smov %s1278_s13 }
  0xbd   : > { %p10_p5 = scmp.ge.s32.totalorder %s13_s14, 4   ;;  %s2329_s13 = smov %s2331_s15 }
  0xbf   :  { %12 = sbr.rel (!%p10_p5) target bundleno = 2 (0x2), region = 70 }

</bundles_post_ra>
